<compile_context>
chip_gen: v7x
topology: tpu7x:2x2x1
jax: 0.10.0
libtpu: 0.0.40
codegen_flags: <defaults>
</compile_context>

<pallas_src>
import functools

import jax
import jax.numpy as jnp
from jax import lax
from jax.experimental import pallas as pl
from jax.experimental.pallas import tpu as pltpu

EPS = 1e-5
MXU_DTYPE = jnp.bfloat16

GROWTH = 32
BN_SIZE = 4
BLOCK_CFG = (6, 12, 24, 16)
NUM_INIT_FEATURES = 64
NUM_CLASSES = 3


# ----------------------------- small helpers -------------------------------

def _round_up(x, m):
    return ((x + m - 1) // m) * m


def _pick_tm(mp):
    """Row tile: multiple of 16 (bf16 sublane packing), preferring >= 2 blocks so
    the second TensorCore on v7x gets work."""
    for c in (256, 128, 64, 32, 16):
        if mp % c == 0 and mp // c >= 2:
            return c
    return mp


def _pick_tn(n):
    """Column tile: 128/256 for aligned N, full extent otherwise (no N padding)."""
    if n % 128 == 0:
        return 256 if (n % 256 == 0 and n > 256) else 128
    return n


# ----------------------------- Pallas kernel --------------------------------

def _mm1_kernel(*refs, prologue, epilogue):
    """Single-K-step MXU matmul with optional fused affine+ReLU prologue/epilogue.

    Ref order: a, b, [in_scale, in_shift], [out_scale, out_shift], out.
    A/B tiles are bf16; the dot accumulates in f32 and the (optional) BN math is f32.
    No VMEM accumulator scratch is needed because the whole K extent is one block.
    """
    it = iter(refs)
    a_ref = next(it)
    b_ref = next(it)
    isc_ref = ish_ref = osc_ref = osh_ref = None
    if prologue:
        isc_ref = next(it)
        ish_ref = next(it)
    if epilogue:
        osc_ref = next(it)
        osh_ref = next(it)
    o_ref = next(it)

    a = a_ref[...]
    if prologue:  # pre-activation BN + ReLU on the input tile (f32 math)
        a = jnp.maximum(a.astype(jnp.float32) * isc_ref[...] + ish_ref[...], 0.0)
        a = a.astype(MXU_DTYPE)
    out = jnp.dot(a, b_ref[...], preferred_element_type=jnp.float32)
    if epilogue:  # BN + ReLU on the output tile (f32 math)
        out = jnp.maximum(out * osc_ref[...] + osh_ref[...], 0.0)
    o_ref[...] = out.astype(o_ref.dtype)


def fused_matmul(a, b, in_scale=None, in_shift=None,
                 out_scale=None, out_shift=None, out_dtype=MXU_DTYPE):
    """out = [bn+relu]( [bn+relu](a) @ b ).

    `b` (shape [Kp, N], Kp a 128-multiple >= K) and the BN slabs ((1, Kp)/(1, N) f32)
    are pre-built at init; the forward path only pads the activation `a`.
    """
    M, K = a.shape
    Kp, N = b.shape
    prologue = in_scale is not None
    epilogue = out_scale is not None
    a = a.astype(MXU_DTYPE)

    # Tiny matmuls (blocks 2-4 at 32x32 input, the 1024x3 classifier): pallas_call
    # fixed overhead + tile padding exceeds the MXU time -> plain XLA dot.
    if M < 128 or N < 16:
        x = a.astype(jnp.float32)
        if Kp != K:
            x = jnp.pad(x, ((0, 0), (0, Kp - K)))
        if prologue:
            x = jnp.maximum(x * in_scale + in_shift, 0.0)
        y = jnp.dot(x.astype(MXU_DTYPE), b, preferred_element_type=jnp.float32)
        if epilogue:
            y = jnp.maximum(y * out_scale + out_shift, 0.0)
        return y.astype(out_dtype)

    # Only the activation is padded at runtime: K up to the pre-padded weight K,
    # M up to a multiple of 16 (bf16 packs two rows per sublane).
    Mp = _round_up(M, 16)
    if (Mp, Kp) != (M, K):
        a = jnp.pad(a, ((0, Mp - M), (0, Kp - K)))

    tm = _pick_tm(Mp)
    tn = _pick_tn(N)

    in_specs = [pl.BlockSpec((tm, Kp), lambda i, j: (i, 0)),
                pl.BlockSpec((Kp, tn), lambda i, j: (0, j))]
    args = [a, b]
    if prologue:
        in_specs += [pl.BlockSpec((1, Kp), lambda i, j: (0, 0)),
                     pl.BlockSpec((1, Kp), lambda i, j: (0, 0))]
        args += [in_scale, in_shift]
    if epilogue:
        in_specs += [pl.BlockSpec((1, tn), lambda i, j: (0, j)),
                     pl.BlockSpec((1, tn), lambda i, j: (0, j))]
        args += [out_scale, out_shift]

    out = pl.pallas_call(
        functools.partial(_mm1_kernel, prologue=prologue, epilogue=epilogue),
        out_shape=jax.ShapeDtypeStruct((Mp, N), out_dtype),
        grid=(Mp // tm, N // tn),
        in_specs=in_specs,
        out_specs=pl.BlockSpec((tm, tn), lambda i, j: (i, j)),
        compiler_params=pltpu.CompilerParams(
            dimension_semantics=("parallel", "parallel")),
    )(*args)
    return out[:M] if Mp != M else out


# ----------------------------- conv / pool glue -----------------------------

def conv2d(x, plan, *, kh, kw, stride=1, pad=0):
    """x: [N,H,W,Cin] bf16. `plan` carries the pre-reshaped/padded weight and any
    fused BN prologue/epilogue slabs (all built once at init)."""
    N, H, W, Cin = x.shape
    Cout = plan["w2"].shape[1]
    Ho = (H + 2 * pad - kh) // stride + 1
    Wo = (W + 2 * pad - kw) // stride + 1
    in_scale = plan.get("in_scale")
    in_shift = plan.get("in_shift")
    if pad:
        assert in_scale is None, "prologue BN fusion requires pad == 0"
        x = jnp.pad(x, ((0, 0), (pad, pad), (pad, pad), (0, 0)))

    if kh == 1 and kw == 1 and stride == 1:
        cols = x.reshape(N * Ho * Wo, Cin)
    else:
        # TODO(synk): materialized im2col (bf16).  Folding the (kh,kw) taps into the
        # K reduction via shifted index_maps would remove this HBM duplication; it is
        # minor at 8x8 feature maps, dominant only at larger resolutions.
        patches = []
        for i in range(kh):
            for j in range(kw):
                patches.append(x[:, i:i + (Ho - 1) * stride + 1:stride,
                                 j:j + (Wo - 1) * stride + 1:stride, :])
        cols = jnp.concatenate(patches, axis=-1).reshape(N * Ho * Wo, kh * kw * Cin)

    out = fused_matmul(cols, plan["w2"],
                       in_scale=in_scale, in_shift=in_shift,
                       out_scale=plan.get("out_scale"), out_shift=plan.get("out_shift"),
                       out_dtype=MXU_DTYPE)
    return out.reshape(N, Ho, Wo, Cout)


def max_pool_3x3_s2_p1(x):
    # TODO(synk): window pooling kept in plain JAX (lax.reduce_window), not Pallas.
    # Done directly in bf16 (max is exact) -> no f32 round trip over the stem map.
    return lax.reduce_window(x, jnp.array(-jnp.inf, x.dtype), lax.max,
                             (1, 3, 3, 1), (1, 2, 2, 1),
                             ((0, 0), (1, 1), (1, 1), (0, 0)))


def avg_pool_2x2(x):
    s = lax.reduce_window(x.astype(jnp.float32), 0.0, lax.add,
                          (1, 2, 2, 1), (1, 2, 2, 1), "VALID")
    return (s * 0.25).astype(x.dtype)


# ----------------------------- DenseNet-121 ---------------------------------

def init_model(key):
    """Build all weights AND every constant transform the matmuls need:
    2-D bf16 weights with K pre-padded to a 128-multiple, folded BN scale/shift
    pre-tiled/padded/reshaped to (1, Kp) / (1, Cout) f32 slabs."""
    state = {"key": key}

    def nxt():
        state["key"], sub = jax.random.split(state["key"])
        return sub

    def bn_fold(c):
        gamma = jax.random.uniform(nxt(), (c,), jnp.float32, 0.5, 1.5)
        beta = jax.random.normal(nxt(), (c,), jnp.float32) * 0.1
        mean = jax.random.normal(nxt(), (c,), jnp.float32) * 0.1
        var = jax.random.uniform(nxt(), (c,), jnp.float32, 0.5, 1.5)
        scale = gamma / jnp.sqrt(var + EPS)     # folded once at init (f32)
        shift = beta - mean * scale
        return scale, shift

    def conv_plan(kh, kw, cin, cout, in_bn=None, out_bn=None):
        fan_in = kh * kw * cin
        w = (jax.random.normal(nxt(), (kh, kw, cin, cout), jnp.float32)
             * (2.0 / fan_in) ** 0.5)
        K = kh * kw * cin
        Kp = _round_up(K, 128)
        w2 = w.reshape(K, cout)
        if Kp != K:
            w2 = jnp.pad(w2, ((0, Kp - K), (0, 0)))      # zero rows (safe padding)
        plan = {"w2": w2.astype(MXU_DTYPE)}               # MXU-native operand dtype
        if in_bn is not None:
            sc = jnp.tile(in_bn[0], kh * kw)
            sh = jnp.tile(in_bn[1], kh * kw)
            if Kp != K:
                # Zero-pad scale AND shift so padded-K columns stay exactly zero
                # through relu(scale*0 + shift).
                sc = jnp.pad(sc, (0, Kp - K))
                sh = jnp.pad(sh, (0, Kp - K))
            plan["in_scale"] = sc.reshape(1, Kp).astype(jnp.float32)
            plan["in_shift"] = sh.reshape(1, Kp).astype(jnp.float32)
        if out_bn is not None:
            plan["out_scale"] = out_bn[0].reshape(1, cout).astype(jnp.float32)
            plan["out_shift"] = out_bn[1].reshape(1, cout).astype(jnp.float32)
        return plan

    model = {"stem": conv_plan(7, 7, 3, NUM_INIT_FEATURES,
                               out_bn=bn_fold(NUM_INIT_FEATURES)),
             "blocks": [], "transitions": []}
    c = NUM_INIT_FEATURES
    for bi, n_layers in enumerate(BLOCK_CFG):
        layers = []
        for _ in range(n_layers):
            layers.append({
                # norm1+relu fused as conv1 prologue, norm2+relu fused as conv1 epilogue
                "conv1": conv_plan(1, 1, c, BN_SIZE * GROWTH,
                                   in_bn=bn_fold(c),
                                   out_bn=bn_fold(BN_SIZE * GROWTH)),
                "conv2": conv_plan(3, 3, BN_SIZE * GROWTH, GROWTH),
            })
            c += GROWTH
        model["blocks"].append(layers)
        if bi != len(BLOCK_CFG) - 1:
            # transition norm+relu fused as the 1x1 conv's prologue
            model["transitions"].append(conv_plan(1, 1, c, c // 2, in_bn=bn_fold(c)))
            c = c // 2

    head_scale, head_shift = bn_fold(c)                  # c == 1024
    model["head_scale"] = head_scale.reshape(1, c)
    model["head_shift"] = head_shift.reshape(1, c)
    model["cls_w"] = jax.random.normal(nxt(), (c, NUM_CLASSES), jnp.float32) * 0.02
    model["cls_b"] = jnp.zeros((NUM_CLASSES,), jnp.float32)
    return model


def dense_block(x, layers):
    """Grow features in a preallocated buffer: each layer writes only its 32 new
    channels (dynamic_update_slice) instead of re-copying the whole growing map.
    (Channel offsets are lane-unaligned at 32-steps; negligible at 8x8 maps.)"""
    N, H, W, C0 = x.shape
    Cf = C0 + GROWTH * len(layers)
    buf = jnp.zeros((N, H, W, Cf), x.dtype)
    buf = lax.dynamic_update_slice(buf, x, (0, 0, 0, 0))
    c = C0
    for layer in layers:
        cur = lax.slice(buf, (0, 0, 0, 0), (N, H, W, c))
        y = conv2d(cur, layer["conv1"], kh=1, kw=1)                 # 1x1 bottleneck
        y = conv2d(y, layer["conv2"], kh=3, kw=3, stride=1, pad=1)  # 3x3, 32 new chans
        buf = lax.dynamic_update_slice(buf, y, (0, 0, 0, c))
        c += GROWTH
    return buf


def densenet121_forward(model, x_nchw):
    x = jnp.transpose(x_nchw, (0, 2, 3, 1)).astype(MXU_DTYPE)   # NCHW -> NHWC, bf16

    # Stem: conv0 with fused norm0+ReLU epilogue, then 3x3/2 maxpool (bf16).
    x = conv2d(x, model["stem"], kh=7, kw=7, stride=2, pad=3)
    x = max_pool_3x3_s2_p1(x)

    # Dense blocks + transitions.
    for bi, layers in enumerate(model["blocks"]):
        x = dense_block(x, layers)
        if bi < len(model["transitions"]):
            x = conv2d(x, model["transitions"][bi], kh=1, kw=1)
            x = avg_pool_2x2(x)

    # Head: norm5 -> relu -> global avg pool -> linear(1024 -> 3).
    # At this input size the slab is N*H*W = 2 rows -> plain XLA elementwise + dot
    # (a pallas_call here would be pure launch overhead).
    N, H, W, C = x.shape
    h = jnp.maximum(x.reshape(-1, C).astype(jnp.float32) * model["head_scale"]
                    + model["head_shift"], 0.0)
    h = jnp.mean(h.reshape(N, H * W, C), axis=1)                 # [N, 1024], f32
    logits = jnp.dot(h, model["cls_w"],
                     preferred_element_type=jnp.float32) + model["cls_b"]
    return logits


# ----------------------------------- main ------------------------------------

if __name__ == "__main__":
    key = jax.random.PRNGKey(0)
    pkey, xkey = jax.random.split(key)
    model = init_model(pkey)

    # Small ImageNet-style input (NCHW like PyTorch).
    x = jax.random.normal(xkey, (2, 3, 32, 32), jnp.float32)

    fwd = jax.jit(densenet121_forward)
    out = jax.block_until_ready(fwd(model, x))
    assert out.shape == (2, NUM_CLASSES)
    print("KERNEL_OK")
</pallas_src>

<mosaic_0001>
module attributes {stable_mosaic.version = 11 : i64} {
  func.func @_mm1_kernel(%arg0: i32, %arg1: i32, %arg2: memref<256x256xbf16, #tpu.memory_space<vmem>>, %arg3: memref<256x64xbf16, #tpu.memory_space<vmem>>, %arg4: memref<1x64xf32, #tpu.memory_space<vmem>>, %arg5: memref<1x64xf32, #tpu.memory_space<vmem>>, %arg6: memref<256x64xbf16, #tpu.memory_space<vmem>>) attributes {dimension_semantics = [#tpu.dimension_semantics<parallel>, #tpu.dimension_semantics<parallel>], iteration_bounds = array<i64: 2, 1>, scalar_prefetch = 0 : i64, scratch_operands = 0 : i64, tpu.core_type = #tpu.core_type<tc>, window_params = [{transform_indices = @transform_0, window_bounds = array<i64: 256, 256>}, {transform_indices = @transform_1, window_bounds = array<i64: 256, 64>}, {transform_indices = @transform_2, window_bounds = array<i64: 1, 64>}, {transform_indices = @transform_3, window_bounds = array<i64: 1, 64>}, {transform_indices = @transform_4, window_bounds = array<i64: 256, 64>}]} {
    %c0 = arith.constant 0 : index
    %c0_0 = arith.constant 0 : index
    %0 = vector.load %arg2[%c0, %c0_0] : memref<256x256xbf16, #tpu.memory_space<vmem>>, vector<256x256xbf16>
    %c0_1 = arith.constant 0 : index
    %c0_2 = arith.constant 0 : index
    %1 = vector.load %arg3[%c0_1, %c0_2] : memref<256x64xbf16, #tpu.memory_space<vmem>>, vector<256x64xbf16>
    %cst = arith.constant dense<0.000000e+00> : vector<256x64xf32>
    %2 = tpu.matmul %0, %1, %cst {dimension_numbers = #tpu.dot_dimension_numbers<[1], [0], [0], [1], [0, 0, 1, 1], [], []>} : vector<256x256xbf16>, vector<256x64xbf16>, vector<256x64xf32> -> vector<256x64xf32>
    %c0_3 = arith.constant 0 : index
    %c0_4 = arith.constant 0 : index
    %3 = vector.load %arg4[%c0_3, %c0_4] : memref<1x64xf32, #tpu.memory_space<vmem>>, vector<1x64xf32>
    %4 = vector.broadcast %3 : vector<1x64xf32> to vector<256x64xf32>
    %5 = arith.mulf %2, %4 : vector<256x64xf32>
    %c0_5 = arith.constant 0 : index
    %c0_6 = arith.constant 0 : index
    %6 = vector.load %arg5[%c0_5, %c0_6] : memref<1x64xf32, #tpu.memory_space<vmem>>, vector<1x64xf32>
    %7 = vector.broadcast %6 : vector<1x64xf32> to vector<256x64xf32>
    %8 = arith.addf %5, %7 : vector<256x64xf32>
    %cst_7 = arith.constant 0.000000e+00 : f32
    %9 = vector.broadcast %cst_7 : f32 to vector<256x64xf32>
    %10 = arith.maximumf %8, %9 : vector<256x64xf32>
    %11 = arith.truncf %10 : vector<256x64xf32> to vector<256x64xbf16>
    %c0_8 = arith.constant 0 : index
    %c0_9 = arith.constant 0 : index
    %12 = vector.load %arg6[%c0_8, %c0_9] : memref<256x64xbf16, #tpu.memory_space<vmem>>, vector<256x64xbf16>
    tpu.vector_store %arg6[%c0_8, %c0_9], %11 {strides = array<i32>} : memref<256x64xbf16, #tpu.memory_space<vmem>>, vector<256x64xbf16>,
    return
  }
  func.func @transform_0(%arg0: i32, %arg1: i32) -> (i32, i32) {
    %c0_i32 = arith.constant 0 : i32
    %c0_i32_0 = arith.constant 0 : i32
    return %arg0, %c0_i32 : i32, i32
  }
  func.func @transform_1(%arg0: i32, %arg1: i32) -> (i32, i32) {
    %c0_i32 = arith.constant 0 : i32
    %c0_i32_0 = arith.constant 0 : i32
    return %c0_i32, %arg1 : i32, i32
  }
  func.func @transform_2(%arg0: i32, %arg1: i32) -> (i32, i32) {
    %c0_i32 = arith.constant 0 : i32
    %c0_i32_0 = arith.constant 0 : i32
    return %c0_i32, %arg1 : i32, i32
  }
  func.func @transform_3(%arg0: i32, %arg1: i32) -> (i32, i32) {
    %c0_i32 = arith.constant 0 : i32
    %c0_i32_0 = arith.constant 0 : i32
    return %c0_i32, %arg1 : i32, i32
  }
  func.func @transform_4(%arg0: i32, %arg1: i32) -> (i32, i32) {
    %c0_i32 = arith.constant 0 : i32
    return %arg0, %arg1 : i32, i32
  }
}

module attributes {stable_mosaic.version = 11 : i64} {
  func.func @_mm1_kernel(%arg0: i32, %arg1: i32, %arg2: memref<64x128xbf16, #tpu.memory_space<vmem>>, %arg3: memref<128x128xbf16, #tpu.memory_space<vmem>>, %arg4: memref<1x128xf32, #tpu.memory_space<vmem>>, %arg5: memref<1x128xf32, #tpu.memory_space<vmem>>, %arg6: memref<1x128xf32, #tpu.memory_space<vmem>>, %arg7: memref<1x128xf32, #tpu.memory_space<vmem>>, %arg8: memref<64x128xbf16, #tpu.memory_space<vmem>>) attributes {dimension_semantics = [#tpu.dimension_semantics<parallel>, #tpu.dimension_semantics<parallel>], iteration_bounds = array<i64: 2, 1>, scalar_prefetch = 0 : i64, scratch_operands = 0 : i64, tpu.core_type = #tpu.core_type<tc>, window_params = [{transform_indices = @transform_0, window_bounds = array<i64: 64, 128>}, {transform_indices = @transform_1, window_bounds = array<i64: 128, 128>}, {pipeline_mode = #tpu.pipeline_mode<synchronous>, transform_indices = @transform_2, window_bounds = array<i64: 1, 128>}, {pipeline_mode = #tpu.pipeline_mode<synchronous>, transform_indices = @transform_3, window_bounds = array<i64: 1, 128>}, {transform_indices = @transform_4, window_bounds = array<i64: 1, 128>}, {transform_indices = @transform_5, window_bounds = array<i64: 1, 128>}, {transform_indices = @transform_6, window_bounds = array<i64: 64, 128>}]} {
    %c0 = arith.constant 0 : index
    %c0_0 = arith.constant 0 : index
    %0 = vector.load %arg2[%c0, %c0_0] : memref<64x128xbf16, #tpu.memory_space<vmem>>, vector<64x128xbf16>
    %1 = arith.extf %0 : vector<64x128xbf16> to vector<64x128xf32>
    %c0_1 = arith.constant 0 : index
    %c0_2 = arith.constant 0 : index
    %2 = vector.load %arg4[%c0_1, %c0_2] : memref<1x128xf32, #tpu.memory_space<vmem>>, vector<1x128xf32>
    %3 = vector.broadcast %2 : vector<1x128xf32> to vector<64x128xf32>
    %4 = arith.mulf %1, %3 : vector<64x128xf32>
    %c0_3 = arith.constant 0 : index
    %c0_4 = arith.constant 0 : index
    %5 = vector.load %arg5[%c0_3, %c0_4] : memref<1x128xf32, #tpu.memory_space<vmem>>, vector<1x128xf32>
    %6 = vector.broadcast %5 : vector<1x128xf32> to vector<64x128xf32>
    %7 = arith.addf %4, %6 : vector<64x128xf32>
    %cst = arith.constant 0.000000e+00 : f32
    %8 = vector.broadcast %cst : f32 to vector<64x128xf32>
    %9 = arith.maximumf %7, %8 : vector<64x128xf32>
    %10 = arith.truncf %9 : vector<64x128xf32> to vector<64x128xbf16>
    %c0_5 = arith.constant 0 : index
    %c0_6 = arith.constant 0 : index
    %11 = vector.load %arg3[%c0_5, %c0_6] : memref<128x128xbf16, #tpu.memory_space<vmem>>, vector<128x128xbf16>
    %cst_7 = arith.constant dense<0.000000e+00> : vector<64x128xf32>
    %12 = tpu.matmul %10, %11, %cst_7 {dimension_numbers = #tpu.dot_dimension_numbers<[1], [0], [0], [1], [0, 0, 1, 1], [], []>} : vector<64x128xbf16>, vector<128x128xbf16>, vector<64x128xf32> -> vector<64x128xf32>
    %c0_8 = arith.constant 0 : index
    %c0_9 = arith.constant 0 : index
    %13 = vector.load %arg6[%c0_8, %c0_9] : memref<1x128xf32, #tpu.memory_space<vmem>>, vector<1x128xf32>
    %14 = vector.broadcast %13 : vector<1x128xf32> to vector<64x128xf32>
    %15 = arith.mulf %12, %14 : vector<64x128xf32>
    %c0_10 = arith.constant 0 : index
    %c0_11 = arith.constant 0 : index
    %16 = vector.load %arg7[%c0_10, %c0_11] : memref<1x128xf32, #tpu.memory_space<vmem>>, vector<1x128xf32>
    %17 = vector.broadcast %16 : vector<1x128xf32> to vector<64x128xf32>
    %18 = arith.addf %15, %17 : vector<64x128xf32>
    %cst_12 = arith.constant 0.000000e+00 : f32
    %19 = vector.broadcast %cst_12 : f32 to vector<64x128xf32>
    %20 = arith.maximumf %18, %19 : vector<64x128xf32>
    %21 = arith.truncf %20 : vector<64x128xf32> to vector<64x128xbf16>
    %c0_13 = arith.constant 0 : index
    %c0_14 = arith.constant 0 : index
    %22 = vector.load %arg8[%c0_13, %c0_14] : memref<64x128xbf16, #tpu.memory_space<vmem>>, vector<64x128xbf16>
    tpu.vector_store %arg8[%c0_13, %c0_14], %21 {strides = array<i32>} : memref<64x128xbf16, #tpu.memory_space<vmem>>, vector<64x128xbf16>,
    return
  }
  func.func @transform_0(%arg0: i32, %arg1: i32) -> (i32, i32) {
    %c0_i32 = arith.constant 0 : i32
    %c0_i32_0 = arith.constant 0 : i32
    return %arg0, %c0_i32 : i32, i32
  }
  func.func @transform_1(%arg0: i32, %arg1: i32) -> (i32, i32) {
    %c0_i32 = arith.constant 0 : i32
    %c0_i32_0 = arith.constant 0 : i32
    return %c0_i32, %arg1 : i32, i32
  }
  func.func @transform_2(%arg0: i32, %arg1: i32) -> (i32, i32) {
    %c0_i32 = arith.constant 0 : i32
    %c0_i32_0 = arith.constant 0 : i32
    %c0_i32_1 = arith.constant 0 : i32
    return %c0_i32, %c0_i32_0 : i32, i32
  }
  func.func @transform_3(%arg0: i32, %arg1: i32) -> (i32, i32) {
    %c0_i32 = arith.constant 0 : i32
    %c0_i32_0 = arith.constant 0 : i32
    %c0_i32_1 = arith.constant 0 : i32
    return %c0_i32, %c0_i32_0 : i32, i32
  }
  func.func @transform_4(%arg0: i32, %arg1: i32) -> (i32, i32) {
    %c0_i32 = arith.constant 0 : i32
    %c0_i32_0 = arith.constant 0 : i32
    return %c0_i32, %arg1 : i32, i32
  }
  func.func @transform_5(%arg0: i32, %arg1: i32) -> (i32, i32) {
    %c0_i32 = arith.constant 0 : i32
    %c0_i32_0 = arith.constant 0 : i32
    return %c0_i32, %arg1 : i32, i32
  }
  func.func @transform_6(%arg0: i32, %arg1: i32) -> (i32, i32) {
    %c0_i32 = arith.constant 0 : i32
    return %arg0, %arg1 : i32, i32
  }
}

module attributes {stable_mosaic.version = 11 : i64} {
  func.func @_mm1_kernel(%arg0: i32, %arg1: i32, %arg2: memref<64x1152xbf16, #tpu.memory_space<vmem>>, %arg3: memref<1152x32xbf16, #tpu.memory_space<vmem>>, %arg4: memref<64x32xbf16, #tpu.memory_space<vmem>>) attributes {dimension_semantics = [#tpu.dimension_semantics<parallel>, #tpu.dimension_semantics<parallel>], iteration_bounds = array<i64: 2, 1>, scalar_prefetch = 0 : i64, scratch_operands = 0 : i64, tpu.core_type = #tpu.core_type<tc>, window_params = [{transform_indices = @transform_0, window_bounds = array<i64: 64, 1152>}, {transform_indices = @transform_1, window_bounds = array<i64: 1152, 32>}, {transform_indices = @transform_2, window_bounds = array<i64: 64, 32>}]} {
    %c0 = arith.constant 0 : index
    %c0_0 = arith.constant 0 : index
    %0 = vector.load %arg2[%c0, %c0_0] : memref<64x1152xbf16, #tpu.memory_space<vmem>>, vector<64x1152xbf16>
    %c0_1 = arith.constant 0 : index
    %c0_2 = arith.constant 0 : index
    %1 = vector.load %arg3[%c0_1, %c0_2] : memref<1152x32xbf16, #tpu.memory_space<vmem>>, vector<1152x32xbf16>
    %cst = arith.constant dense<0.000000e+00> : vector<64x32xf32>
    %2 = tpu.matmul %0, %1, %cst {dimension_numbers = #tpu.dot_dimension_numbers<[1], [0], [0], [1], [0, 0, 1, 1], [], []>} : vector<64x1152xbf16>, vector<1152x32xbf16>, vector<64x32xf32> -> vector<64x32xf32>
    %3 = arith.truncf %2 : vector<64x32xf32> to vector<64x32xbf16>
    %c0_3 = arith.constant 0 : index
    %c0_4 = arith.constant 0 : index
    %4 = vector.load %arg4[%c0_3, %c0_4] : memref<64x32xbf16, #tpu.memory_space<vmem>>, vector<64x32xbf16>
    tpu.vector_store %arg4[%c0_3, %c0_4], %3 {strides = array<i32>} : memref<64x32xbf16, #tpu.memory_space<vmem>>, vector<64x32xbf16>,
    return
  }
  func.func @transform_0(%arg0: i32, %arg1: i32) -> (i32, i32) {
    %c0_i32 = arith.constant 0 : i32
    %c0_i32_0 = arith.constant 0 : i32
    return %arg0, %c0_i32 : i32, i32
  }
  func.func @transform_1(%arg0: i32, %arg1: i32) -> (i32, i32) {
    %c0_i32 = arith.constant 0 : i32
    %c0_i32_0 = arith.constant 0 : i32
    return %c0_i32, %arg1 : i32, i32
  }
  func.func @transform_2(%arg0: i32, %arg1: i32) -> (i32, i32) {
    %c0_i32 = arith.constant 0 : i32
    return %arg0, %arg1 : i32, i32
  }
}

module attributes {stable_mosaic.version = 11 : i64} {
  func.func @_mm1_kernel(%arg0: i32, %arg1: i32, %arg2: memref<64x256xbf16, #tpu.memory_space<vmem>>, %arg3: memref<256x128xbf16, #tpu.memory_space<vmem>>, %arg4: memref<1x256xf32, #tpu.memory_space<vmem>>, %arg5: memref<1x256xf32, #tpu.memory_space<vmem>>, %arg6: memref<1x128xf32, #tpu.memory_space<vmem>>, %arg7: memref<1x128xf32, #tpu.memory_space<vmem>>, %arg8: memref<64x128xbf16, #tpu.memory_space<vmem>>) attributes {dimension_semantics = [#tpu.dimension_semantics<parallel>, #tpu.dimension_semantics<parallel>], iteration_bounds = array<i64: 2, 1>, scalar_prefetch = 0 : i64, scratch_operands = 0 : i64, tpu.core_type = #tpu.core_type<tc>, window_params = [{transform_indices = @transform_0, window_bounds = array<i64: 64, 256>}, {transform_indices = @transform_1, window_bounds = array<i64: 256, 128>}, {pipeline_mode = #tpu.pipeline_mode<synchronous>, transform_indices = @transform_2, window_bounds = array<i64: 1, 256>}, {pipeline_mode = #tpu.pipeline_mode<synchronous>, transform_indices = @transform_3, window_bounds = array<i64: 1, 256>}, {transform_indices = @transform_4, window_bounds = array<i64: 1, 128>}, {transform_indices = @transform_5, window_bounds = array<i64: 1, 128>}, {transform_indices = @transform_6, window_bounds = array<i64: 64, 128>}]} {
    %c0 = arith.constant 0 : index
    %c0_0 = arith.constant 0 : index
    %0 = vector.load %arg2[%c0, %c0_0] : memref<64x256xbf16, #tpu.memory_space<vmem>>, vector<64x256xbf16>
    %1 = arith.extf %0 : vector<64x256xbf16> to vector<64x256xf32>
    %c0_1 = arith.constant 0 : index
    %c0_2 = arith.constant 0 : index
    %2 = vector.load %arg4[%c0_1, %c0_2] : memref<1x256xf32, #tpu.memory_space<vmem>>, vector<1x256xf32>
    %3 = vector.broadcast %2 : vector<1x256xf32> to vector<64x256xf32>
    %4 = arith.mulf %1, %3 : vector<64x256xf32>
    %c0_3 = arith.constant 0 : index
    %c0_4 = arith.constant 0 : index
    %5 = vector.load %arg5[%c0_3, %c0_4] : memref<1x256xf32, #tpu.memory_space<vmem>>, vector<1x256xf32>
    %6 = vector.broadcast %5 : vector<1x256xf32> to vector<64x256xf32>
    %7 = arith.addf %4, %6 : vector<64x256xf32>
    %cst = arith.constant 0.000000e+00 : f32
    %8 = vector.broadcast %cst : f32 to vector<64x256xf32>
    %9 = arith.maximumf %7, %8 : vector<64x256xf32>
    %10 = arith.truncf %9 : vector<64x256xf32> to vector<64x256xbf16>
    %c0_5 = arith.constant 0 : index
    %c0_6 = arith.constant 0 : index
    %11 = vector.load %arg3[%c0_5, %c0_6] : memref<256x128xbf16, #tpu.memory_space<vmem>>, vector<256x128xbf16>
    %cst_7 = arith.constant dense<0.000000e+00> : vector<64x128xf32>
    %12 = tpu.matmul %10, %11, %cst_7 {dimension_numbers = #tpu.dot_dimension_numbers<[1], [0], [0], [1], [0, 0, 1, 1], [], []>} : vector<64x256xbf16>, vector<256x128xbf16>, vector<64x128xf32> -> vector<64x128xf32>
    %c0_8 = arith.constant 0 : index
    %c0_9 = arith.constant 0 : index
    %13 = vector.load %arg6[%c0_8, %c0_9] : memref<1x128xf32, #tpu.memory_space<vmem>>, vector<1x128xf32>
    %14 = vector.broadcast %13 : vector<1x128xf32> to vector<64x128xf32>
    %15 = arith.mulf %12, %14 : vector<64x128xf32>
    %c0_10 = arith.constant 0 : index
    %c0_11 = arith.constant 0 : index
    %16 = vector.load %arg7[%c0_10, %c0_11] : memref<1x128xf32, #tpu.memory_space<vmem>>, vector<1x128xf32>
    %17 = vector.broadcast %16 : vector<1x128xf32> to vector<64x128xf32>
    %18 = arith.addf %15, %17 : vector<64x128xf32>
    %cst_12 = arith.constant 0.000000e+00 : f32
    %19 = vector.broadcast %cst_12 : f32 to vector<64x128xf32>
    %20 = arith.maximumf %18, %19 : vector<64x128xf32>
    %21 = arith.truncf %20 : vector<64x128xf32> to vector<64x128xbf16>
    %c0_13 = arith.constant 0 : index
    %c0_14 = arith.constant 0 : index
    %22 = vector.load %arg8[%c0_13, %c0_14] : memref<64x128xbf16, #tpu.memory_space<vmem>>, vector<64x128xbf16>
    tpu.vector_store %arg8[%c0_13, %c0_14], %21 {strides = array<i32>} : memref<64x128xbf16, #tpu.memory_space<vmem>>, vector<64x128xbf16>,
    return
  }
  func.func @transform_0(%arg0: i32, %arg1: i32) -> (i32, i32) {
    %c0_i32 = arith.constant 0 : i32
    %c0_i32_0 = arith.constant 0 : i32
    return %arg0, %c0_i32 : i32, i32
  }
  func.func @transform_1(%arg0: i32, %arg1: i32) -> (i32, i32) {
    %c0_i32 = arith.constant 0 : i32
    %c0_i32_0 = arith.constant 0 : i32
    return %c0_i32, %arg1 : i32, i32
  }
  func.func @transform_2(%arg0: i32, %arg1: i32) -> (i32, i32) {
    %c0_i32 = arith.constant 0 : i32
    %c0_i32_0 = arith.constant 0 : i32
    %c0_i32_1 = arith.constant 0 : i32
    return %c0_i32, %c0_i32_0 : i32, i32
  }
  func.func @transform_3(%arg0: i32, %arg1: i32) -> (i32, i32) {
    %c0_i32 = arith.constant 0 : i32
    %c0_i32_0 = arith.constant 0 : i32
    %c0_i32_1 = arith.constant 0 : i32
    return %c0_i32, %c0_i32_0 : i32, i32
  }
  func.func @transform_4(%arg0: i32, %arg1: i32) -> (i32, i32) {
    %c0_i32 = arith.constant 0 : i32
    %c0_i32_0 = arith.constant 0 : i32
    return %c0_i32, %arg1 : i32, i32
  }
  func.func @transform_5(%arg0: i32, %arg1: i32) -> (i32, i32) {
    %c0_i32 = arith.constant 0 : i32
    %c0_i32_0 = arith.constant 0 : i32
    return %c0_i32, %arg1 : i32, i32
  }
  func.func @transform_6(%arg0: i32, %arg1: i32) -> (i32, i32) {
    %c0_i32 = arith.constant 0 : i32
    return %arg0, %arg1 : i32, i32
  }
}

module attributes {stable_mosaic.version = 11 : i64} {
  func.func @_mm1_kernel(%arg0: i32, %arg1: i32, %arg2: memref<64x256xbf16, #tpu.memory_space<vmem>>, %arg3: memref<256x128xbf16, #tpu.memory_space<vmem>>, %arg4: memref<1x256xf32, #tpu.memory_space<vmem>>, %arg5: memref<1x256xf32, #tpu.memory_space<vmem>>, %arg6: memref<64x128xbf16, #tpu.memory_space<vmem>>) attributes {dimension_semantics = [#tpu.dimension_semantics<parallel>, #tpu.dimension_semantics<parallel>], iteration_bounds = array<i64: 2, 1>, scalar_prefetch = 0 : i64, scratch_operands = 0 : i64, tpu.core_type = #tpu.core_type<tc>, window_params = [{transform_indices = @transform_0, window_bounds = array<i64: 64, 256>}, {transform_indices = @transform_1, window_bounds = array<i64: 256, 128>}, {pipeline_mode = #tpu.pipeline_mode<synchronous>, transform_indices = @transform_2, window_bounds = array<i64: 1, 256>}, {pipeline_mode = #tpu.pipeline_mode<synchronous>, transform_indices = @transform_3, window_bounds = array<i64: 1, 256>}, {transform_indices = @transform_4, window_bounds = array<i64: 64, 128>}]} {
    %c0 = arith.constant 0 : index
    %c0_0 = arith.constant 0 : index
    %0 = vector.load %arg2[%c0, %c0_0] : memref<64x256xbf16, #tpu.memory_space<vmem>>, vector<64x256xbf16>
    %1 = arith.extf %0 : vector<64x256xbf16> to vector<64x256xf32>
    %c0_1 = arith.constant 0 : index
    %c0_2 = arith.constant 0 : index
    %2 = vector.load %arg4[%c0_1, %c0_2] : memref<1x256xf32, #tpu.memory_space<vmem>>, vector<1x256xf32>
    %3 = vector.broadcast %2 : vector<1x256xf32> to vector<64x256xf32>
    %4 = arith.mulf %1, %3 : vector<64x256xf32>
    %c0_3 = arith.constant 0 : index
    %c0_4 = arith.constant 0 : index
    %5 = vector.load %arg5[%c0_3, %c0_4] : memref<1x256xf32, #tpu.memory_space<vmem>>, vector<1x256xf32>
    %6 = vector.broadcast %5 : vector<1x256xf32> to vector<64x256xf32>
    %7 = arith.addf %4, %6 : vector<64x256xf32>
    %cst = arith.constant 0.000000e+00 : f32
    %8 = vector.broadcast %cst : f32 to vector<64x256xf32>
    %9 = arith.maximumf %7, %8 : vector<64x256xf32>
    %10 = arith.truncf %9 : vector<64x256xf32> to vector<64x256xbf16>
    %c0_5 = arith.constant 0 : index
    %c0_6 = arith.constant 0 : index
    %11 = vector.load %arg3[%c0_5, %c0_6] : memref<256x128xbf16, #tpu.memory_space<vmem>>, vector<256x128xbf16>
    %cst_7 = arith.constant dense<0.000000e+00> : vector<64x128xf32>
    %12 = tpu.matmul %10, %11, %cst_7 {dimension_numbers = #tpu.dot_dimension_numbers<[1], [0], [0], [1], [0, 0, 1, 1], [], []>} : vector<64x256xbf16>, vector<256x128xbf16>, vector<64x128xf32> -> vector<64x128xf32>
    %13 = arith.truncf %12 : vector<64x128xf32> to vector<64x128xbf16>
    %c0_8 = arith.constant 0 : index
    %c0_9 = arith.constant 0 : index
    %14 = vector.load %arg6[%c0_8, %c0_9] : memref<64x128xbf16, #tpu.memory_space<vmem>>, vector<64x128xbf16>
    tpu.vector_store %arg6[%c0_8, %c0_9], %13 {strides = array<i32>} : memref<64x128xbf16, #tpu.memory_space<vmem>>, vector<64x128xbf16>,
    return
  }
  func.func @transform_0(%arg0: i32, %arg1: i32) -> (i32, i32) {
    %c0_i32 = arith.constant 0 : i32
    %c0_i32_0 = arith.constant 0 : i32
    return %arg0, %c0_i32 : i32, i32
  }
  func.func @transform_1(%arg0: i32, %arg1: i32) -> (i32, i32) {
    %c0_i32 = arith.constant 0 : i32
    %c0_i32_0 = arith.constant 0 : i32
    return %c0_i32, %arg1 : i32, i32
  }
  func.func @transform_2(%arg0: i32, %arg1: i32) -> (i32, i32) {
    %c0_i32 = arith.constant 0 : i32
    %c0_i32_0 = arith.constant 0 : i32
    %c0_i32_1 = arith.constant 0 : i32
    return %c0_i32, %c0_i32_0 : i32, i32
  }
  func.func @transform_3(%arg0: i32, %arg1: i32) -> (i32, i32) {
    %c0_i32 = arith.constant 0 : i32
    %c0_i32_0 = arith.constant 0 : i32
    %c0_i32_1 = arith.constant 0 : i32
    return %c0_i32, %c0_i32_0 : i32, i32
  }
  func.func @transform_4(%arg0: i32, %arg1: i32) -> (i32, i32) {
    %c0_i32 = arith.constant 0 : i32
    return %arg0, %arg1 : i32, i32
  }
}

</mosaic_0001>

<bundles_post_ra>
// kernel: densenet121_forward.15
= control target key start
LH: loop header
LB: loop body
LE: loop exit
PB: predicated region body
PF: predicated region fallthrough
CT: control target
= control target key end

     0   :  { %s927_s21 = smov 0   ;;  %s929_s22 = smov 0   ;;  %s1003_s0 = inlined_call_operand.vmem [shape: bf16[128,128], index: 0, kind: input, shape index: {}]   ;;  %s1004_s1 = inlined_call_operand.vmem [shape: bf16[128,128], index: 1, kind: input, shape index: {}]   ;;  %s1005_s2 = inlined_call_operand.vmem [shape: f32[1,128], index: 2, kind: input, shape index: {}]   ;;  %s1006_s3 = inlined_call_operand.vmem [shape: f32[1,128], index: 3, kind: input, shape index: {}]   ;;  %s1007_s4 = inlined_call_operand.vmem [shape: f32[1,128], index: 4, kind: input, shape index: {}]   ;;  %s1008_s5 = inlined_call_operand.vmem [shape: f32[1,128], index: 5, kind: input, shape index: {}]   ;;  %s1009_s6 = inlined_call_operand.vmem [shape: bf16[128,128], index: 6, kind: output, shape index: {}]  }
   0x1   :  { %s931_s23 = smov 0  }
   0x2 LB: > { %s28_s24 = sadd.s32 1, %s886_s22  ;;  %p707_p0 = scmp.ge.s32.totalorder %s890_s23, 1  ;;  %s890_s23 = sphi %s931_s23, %s16_s23   ;;  %s886_s22 = sphi %s929_s22, %s1011_s22   ;;  %s882_s21 = sphi %s927_s21, %s1010_s21  }
   0x3   : > { %p30_p1 = scmp.ge.s32.totalorder %s28_s24, 2  ;;  %p252_p2 = scmp.lt.s32.totalorder %s890_s23, 3 }
   0x5   : > { %s1013_s24 = smov (%p30_p1, %s28_s24), 0  ;;  %p253_p3 = pnand %p707_p0, %p252_p2 }
   0x6   : > { %v860_v0 = vld [vmem:[%s1004_s1] sm:$0xff] (!%p253_p3)   ;;  %s708_s27 = sshll.u32 (!%p253_p3), %s882_s21, 3  ;;  %v861_v1 = vld [vmem:[%s1004_s1 + $0x8] sm:$0xff] (!%p253_p3)   ;;  %v862_v2 = vld [vmem:[%s1004_s1 + $0x10] sm:$0xff] (!%p253_p3)  }
   0x7   : > { %256 = sbr.rel (%p253_p3) target bundleno = 264 (0x108), region = 44  ;;  %p296_p4 = scmp.lt.s32.totalorder (!%p253_p3), %s708_s27, 15  ;;  %796 = vmatprep.subr.bf16.mxu0 (!%p253_p3), %v860_v0  ;;  %820 = vmatprep.subr.bf16.mxu1 (!%p253_p3), %v860_v0  ;;  %v863_v3 = vld [vmem:[%s1004_s1 + $0x18] sm:$0xff] (!%p253_p3)   ;;  %v712_v5 = vld [vmem:[%s1005_s2] ss:$0 sm:$0xff] (!%p253_p3)  ;;  %v865_v29 = vld [vmem:[%s1004_s1 + $0x28] sm:$0xff] (!%p253_p3)  }
   0x8   : > { %797 = vmatpush3.bf16.msra.mxu0 (!%p253_p3), %v860_v0  ;;  %828 = vmatpush3.bf16.msra.mxu1 (!%p253_p3), %v860_v0  ;;  %v713_v9 = vld [vmem:[%s1006_s3] ss:$0 sm:$0xff] (!%p253_p3)  ;;  %v866_v38 = vld [vmem:[%s1004_s1 + $0x30] sm:$0xff] (!%p253_p3)   ;;  %v867_v43 = vld [vmem:[%s1004_s1 + $0x38] sm:$0xff] (!%p253_p3)  }
   0x9   : > { %798 = vmatprep.subr.bf16.mxu0 (!%p253_p3), %v861_v1  ;;  %821 = vmatprep.subr.bf16.mxu1 (!%p253_p3), %v861_v1  ;;  %v864_v16 = vld [vmem:[%s1004_s1 + $0x20] sm:$0xff] (!%p253_p3)  }
   0xa   : > { %v722_v50 = vld [vmem:[%s1007_s4] ss:$0 sm:$0xff] (!%p253_p3) }
   0xb   : > { %v723_v52 = vld [vmem:[%s1008_s5] ss:$0 sm:$0xff] (!%p253_p3) }
   0xc   : > { %799 = vmatpush3.bf16.msra.mxu0 (!%p253_p3), %v861_v1  ;;  %829 = vmatpush3.bf16.msra.mxu1 (!%p253_p3), %v861_v1 }
   0xd   : > { %800 = vmatprep.subr.bf16.mxu0 (!%p253_p3), %v862_v2  ;;  %822 = vmatprep.subr.bf16.mxu1 (!%p253_p3), %v862_v2 }
   0xe   : > { %s1015_s27 = smov (!%p296_p4, %s708_s27), 15 }
   0xf   : > { %s709_s8 = sshll.u32 %s1015_s27, 2 }
  0x10   : > { %s299_s11 = scalar_lea.vmem %s1003_s0, %s709_s8  ;;  %801 = vmatpush3.bf16.msra.mxu0 %v862_v2  ;;  %830 = vmatpush3.bf16.msra.mxu1 %v862_v2  ;;  %s318_s13 = scalar_lea.vmem %s1009_s6, %s709_s8 }
  0x11   : > { %v743_v4 = vld [vmem:[%s299_s11] sm:$0xff]   ;;  %v779_v8 = vld [vmem:[%s299_s11 + $0x10] sm:$0xff]   ;;  %v778_v12 = vld [vmem:[%s299_s11 + $0x8] sm:$0xff]   ;;  %802 = vmatprep.subr.bf16.mxu0 %v863_v3  ;;  %823 = vmatprep.subr.bf16.mxu1 %v863_v3 }
  0x12   : > { %v744_v6 = vunpack.c.l.bf16 %v743_v4  ;;  %v745_v7 = vunpack.c.h.bf16 %v743_v4  ;;  %v752_v10 = vunpack.c.l.bf16 %v779_v8  ;;  %v753_v11 = vunpack.c.h.bf16 %v779_v8  ;;  %v780_v15 = vld [vmem:[%s299_s11 + $0x18] sm:$0xff]  }
  0x13   : > { %v748_v21 = vunpack.c.l.bf16 %v778_v12  ;;  %v749_v22 = vunpack.c.h.bf16 %v778_v12  ;;  %v756_v25 = vunpack.c.l.bf16 %v780_v15  ;;  %v757_v26 = vunpack.c.h.bf16 %v780_v15 }
  0x14   : > { %v344_v13 = vmul.f32 %v744_v6, %v712_v5  ;;  %v345_v14 = vmul.f32 %v745_v7, %v712_v5  ;;  %v348_v17 = vmul.f32 %v752_v10, %v712_v5  ;;  %v349_v18 = vmul.f32 %v753_v11, %v712_v5  ;;  %803 = vmatpush3.bf16.msra.mxu0 %v863_v3 }
  0x15   : > { %831 = vmatpush3.bf16.msra.mxu1 %v863_v3  ;;  %804 = vmatprep.subr.bf16.mxu0 %v864_v16  ;;  %v346_v33 = vmul.f32 %v748_v21, %v712_v5  ;;  %v347_v35 = vmul.f32 %v749_v22, %v712_v5  ;;  %v350_v36 = vmul.f32 %v756_v25, %v712_v5 }
  0x16   : > { %v359_v19 = vadd.f32 %v713_v9, %v344_v13  ;;  %v360_v20 = vadd.f32 %v713_v9, %v345_v14  ;;  %v363_v23 = vadd.f32 %v713_v9, %v348_v17  ;;  %v364_v24 = vadd.f32 %v713_v9, %v349_v18  ;;  %824 = vmatprep.subr.bf16.mxu1 %v864_v16 }
  0x17   : > { %v351_v37 = vmul.f32 %v757_v26, %v712_v5  ;;  %v361_v39 = vadd.f32 %v713_v9, %v346_v33  ;;  %v362_v40 = vadd.f32 %v713_v9, %v347_v35  ;;  %v365_v41 = vadd.f32 %v713_v9, %v350_v36 }
  0x18   : > { %v367_v27 = vmax.f32 %v359_v19, 0.0  ;;  %v368_v28 = vmax.f32 %v360_v20, 0.0  ;;  %v371_v30 = vmax.f32 %v363_v23, 0.0  ;;  %v372_v31 = vmax.f32 %v364_v24, 0.0  ;;  %805 = vmatpush3.bf16.msra.mxu0 %v864_v16 }
  0x19   : > { %832 = vmatpush3.bf16.msra.mxu1 %v864_v16  ;;  %806 = vmatprep.subr.bf16.mxu0 %v865_v29  ;;  %v366_v42 = vadd.f32 %v713_v9, %v351_v37  ;;  %v369_v44 = vmax.f32 %v361_v39, 0.0  ;;  %v370_v45 = vmax.f32 %v362_v40, 0.0  ;;  %v373_v46 = vmax.f32 %v365_v41, 0.0 }
  0x1a   : > { %v375_v32 = vpack.c.bf16 %v368_v28, %v367_v27  ;;  %v377_v34 = vpack.c.bf16 %v372_v31, %v371_v30  ;;  %825 = vmatprep.subr.bf16.mxu1 %v865_v29 }
  0x1b   : > { %v374_v47 = vmax.f32 %v366_v42, 0.0  ;;  %v376_v48 = vpack.c.bf16 %v370_v45, %v369_v44 }
  0x1c   : > { %812 = vmatprep.mubr.bf16.mxu0 %v375_v32  ;;  %816 = vmatprep.mubr.bf16.mxu1 %v377_v34 }
  0x1d   : > { %807 = vmatpush3.bf16.msra.mxu0 %v865_v29  ;;  %833 = vmatpush3.bf16.msra.mxu1 %v865_v29  ;;  %v378_v49 = vpack.c.bf16 %v374_v47, %v373_v46 }
  0x1e   : > { %808 = vmatprep.subr.bf16.mxu0 %v866_v38  ;;  %826 = vmatprep.subr.bf16.mxu1 %v866_v38 }
  0x21   : > { %809 = vmatpush3.bf16.msra.mxu0 %v866_v38  ;;  %834 = vmatpush3.bf16.msra.mxu1 %v866_v38 }
  0x22   : > { %810 = vmatprep.subr.bf16.mxu0 %v867_v43  ;;  %827 = vmatprep.subr.bf16.mxu1 %v867_v43 }
  0x25   : > { %811 = vmatpush3.bf16.msra.mxu0 %v867_v43  ;;  %835 = vmatpush3.bf16.msra.mxu1 %v867_v43 }
  0x28   : > { %813 = vmatmul.mubr.bf16.vlgmr.msra.gmra.mrb[0].mxu0 %v376_v48  ;;  %817 = vmatmul.mubr.bf16.vlgmr.msra.gmra.mrb[0].mxu1 %v378_v49 }
  0xfb   : > { %v814_v51 = vpop.f32.mrb[0].mxu0  ;;  %v818_v53 = vpop.f32.mrb[0].mxu1 }
  0xfc   : > { %v517_v54 = vmul.f32 %v814_v51, %v722_v50  ;;  %v521_v55 = vmul.f32 %v818_v53, %v722_v50  ;;  %v477_v56 = vpop.f32.mrb[1].mxu0  ;;  %v493_v57 = vpop.f32.mrb[1].mxu1 }
  0xfd   : > { %v515_v58 = vmul.f32 %v722_v50, %v477_v56  ;;  %v519_v59 = vmul.f32 %v722_v50, %v493_v57  ;;  %v815_v60 = vpop.f32.mrb[2].mxu0  ;;  %v819_v61 = vpop.f32.mrb[2].mxu1 }
  0xfe   : > { %v532_v62 = vadd.f32 %v723_v52, %v517_v54  ;;  %v536_v63 = vadd.f32 %v723_v52, %v521_v55  ;;  %v518_v0 = vmul.f32 %v815_v60, %v722_v50  ;;  %v522_v1 = vmul.f32 %v819_v61, %v722_v50  ;;  %v480_v2 = vpop.f32.mrb[3].mxu0  ;;  %v496_v3 = vpop.f32.mrb[3].mxu1 }
  0xff   : > { %v530_v4 = vadd.f32 %v723_v52, %v515_v58  ;;  %v534_v5 = vadd.f32 %v723_v52, %v519_v59  ;;  %v516_v6 = vmul.f32 %v722_v50, %v480_v2  ;;  %v520_v7 = vmul.f32 %v722_v50, %v496_v3 }
 0x100   : > { %v533_v8 = vadd.f32 %v723_v52, %v518_v0  ;;  %v537_v9 = vadd.f32 %v723_v52, %v522_v1  ;;  %v540_v12 = vmax.f32 %v532_v62, 0.0  ;;  %v544_v13 = vmax.f32 %v536_v63, 0.0 }
 0x101   : > { %v531_v10 = vadd.f32 %v723_v52, %v516_v6  ;;  %v535_v11 = vadd.f32 %v723_v52, %v520_v7  ;;  %v538_v16 = vmax.f32 %v530_v4, 0.0  ;;  %v542_v17 = vmax.f32 %v534_v5, 0.0 }
 0x102   : > { %v541_v14 = vmax.f32 %v533_v8, 0.0  ;;  %v545_v15 = vmax.f32 %v537_v9, 0.0 }
 0x103   : > { %v539_v18 = vmax.f32 %v531_v10, 0.0  ;;  %v543_v19 = vmax.f32 %v535_v11, 0.0 }
 0x104   : > { %v766_v20 = vpack.c.bf16 %v541_v14, %v540_v12  ;;  %v776_v21 = vpack.c.bf16 %v545_v15, %v544_v13 }
 0x105   : > { %v761_v22 = vpack.c.bf16 %v539_v18, %v538_v16  ;;  %v771_v23 = vpack.c.bf16 %v543_v19, %v542_v17 }
 0x106   : > { %781 = vst [vmem:[%s318_s13 + $0x8] sm:$0xff] %v766_v20   ;;  %783 = vst [vmem:[%s318_s13 + $0x18] sm:$0xff] %v776_v21  }
 0x107   : > { %762 = vst [vmem:[%s318_s13] sm:$0xff] %v761_v22   ;;  %782 = vst [vmem:[%s318_s13 + $0x10] sm:$0xff] %v771_v23  }
 0x108 PF: > { %s16_s23 = sadd.s32 1, %s890_s23   ;;  %s1010_s21 = smov %s886_s22 }
 0x109   : > { %p13_p5 = scmp.ge.s32.totalorder %s16_s23, 4   ;;  %s1011_s22 = smov %s1013_s24 }
 0x10b   :  { %15 = sbr.rel (!%p13_p5) target bundleno = 2 (0x2), region = 83 }

// kernel: densenet121_forward.14
= control target key start
LH: loop header
LB: loop body
LE: loop exit
PB: predicated region body
PF: predicated region fallthrough
CT: control target
= control target key end

     0   :  { %s1531_s15 = smov 0   ;;  %s1533_s16 = smov 0   ;;  %s1790_s0 = inlined_call_operand.vmem [shape: bf16[512,256], index: 0, kind: input, shape index: {}]   ;;  %s1791_s1 = inlined_call_operand.vmem [shape: bf16[256,64], index: 1, kind: input, shape index: {}]   ;;  %s1792_s2 = inlined_call_operand.vmem [shape: f32[1,64], index: 2, kind: input, shape index: {}]   ;;  %s1793_s3 = inlined_call_operand.vmem [shape: f32[1,64], index: 3, kind: input, shape index: {}]   ;;  %s1794_s4 = inlined_call_operand.vmem [shape: bf16[512,64], index: 4, kind: output, shape index: {}]  }
   0x1   :  { %s1535_s17 = smov 0  }
   0x2 LB: > { %s26_s18 = sadd.s32 1, %s1500_s16  ;;  %p1143_p0 = scmp.ge.s32.totalorder %s1504_s17, 1  ;;  %s1504_s17 = sphi %s1535_s17, %s14_s17   ;;  %s1500_s16 = sphi %s1533_s16, %s1796_s16   ;;  %s1496_s15 = sphi %s1531_s15, %s1795_s15  }
   0x3   : > { %p28_p1 = scmp.ge.s32.totalorder %s26_s18, 2  ;;  %p203_p2 = scmp.lt.s32.totalorder %s1504_s17, 3 }
   0x5   : > { %s1798_s18 = smov (%p28_p1, %s26_s18), 0  ;;  %p204_p3 = pnand %p1143_p0, %p203_p2 }
   0x6   : > { %v1418_v0 = vld [vmem:[%s1791_s1 + $0x40] sm:$0xff] (!%p204_p3)   ;;  %s1144_s21 = sshll.u32 (!%p204_p3), %s1496_s15, 5  ;;  %v1420_v2 = vld [vmem:[%s1791_s1 + $0x48] sm:$0xff] (!%p204_p3)   ;;  %v1422_v4 = vld [vmem:[%s1791_s1 + $0x50] sm:$0xff] (!%p204_p3)   ;;  %vm989_vm0 = vcmask (!%p204_p3), 519168  }
   0x7   : > { %207 = sbr.rel (%p204_p3) target bundleno = 321 (0x141), region = 36  ;;  %v1419_v1 = vld [vmem:[%s1791_s1] sm:$0xff] (!%p204_p3)   ;;  %1266 = vmatprep.subr.bf16.mxu0 (!%p204_p3), %v1418_v0  ;;  %1378 = vmatprep.subr.bf16.mxu1 (!%p204_p3), %v1418_v0  ;;  %v1421_v3 = vld [vmem:[%s1791_s1 + $0x8] sm:$0xff] (!%p204_p3)   ;;  %p244_p4 = scmp.lt.s32.totalorder (!%p204_p3), %s1144_s21, 63  ;;  %v1423_v5 = vld [vmem:[%s1791_s1 + $0x10] sm:$0xff] (!%p204_p3)  }
   0x8   : > { %1267 = vmatpush3.bf16.msra.mxu0 (!%p204_p3), %v1419_v1  ;;  %1386 = vmatpush3.bf16.msra.mxu1 (!%p204_p3), %v1419_v1  ;;  %v1424_v6 = vld [vmem:[%s1791_s1 + $0x58] sm:$0xff] (!%p204_p3)   ;;  %v1426_v8 = vld [vmem:[%s1791_s1 + $0x60] sm:$0xff] (!%p204_p3)   ;;  %v1428_v10 = vld [vmem:[%s1791_s1 + $0x68] sm:$0xff] (!%p204_p3)  }
   0x9   : > { %1268 = vmatprep.subr.bf16.mxu0 (!%p204_p3), %v1420_v2  ;;  %1379 = vmatprep.subr.bf16.mxu1 (!%p204_p3), %v1420_v2  ;;  %v1425_v7 = vld [vmem:[%s1791_s1 + $0x18] sm:$0xff] (!%p204_p3)   ;;  %v1427_v9 = vld [vmem:[%s1791_s1 + $0x20] sm:$0xff] (!%p204_p3)   ;;  %v1429_v13 = vld [vmem:[%s1791_s1 + $0x28] sm:$0xff] (!%p204_p3)  }
   0xa   : > { %v1430_v14 = vld [vmem:[%s1791_s1 + $0x70] sm:$0xff] (!%p204_p3)   ;;  %v1432_v16 = vld [vmem:[%s1791_s1 + $0x78] sm:$0xff] (!%p204_p3)   ;;  %v1640_v51 = vld [vmem:[%s1792_s2] ss:$0 sm:$0xff] (!%p204_p3) }
   0xb   : > { %v1431_v15 = vld [vmem:[%s1791_s1 + $0x30] sm:$0xff] (!%p204_p3)   ;;  %v1433_v17 = vld [vmem:[%s1791_s1 + $0x38] sm:$0xff] (!%p204_p3)   ;;  %v1645_v57 = vld [vmem:[%s1793_s3] ss:$0 sm:$0xff] (!%p204_p3) }
   0xc   : > { %1269 = vmatpush3.bf16.msra.mxu0 (!%p204_p3), %v1421_v3  ;;  %1387 = vmatpush3.bf16.msra.mxu1 (!%p204_p3), %v1421_v3 }
   0xd   : > { %1270 = vmatprep.subr.bf16.mxu0 (!%p204_p3), %v1422_v4  ;;  %1380 = vmatprep.subr.bf16.mxu1 (!%p204_p3), %v1422_v4 }
   0xe   : > { %s1800_s21 = smov (!%p244_p4, %s1144_s21), 63 }
   0xf   : > { %s1233_s10 = sshll.u32 %s1800_s21, 3  ;;  %s1148_s12 = sshll.u32 %s1800_s21, 2 }
  0x10   : > { %1271 = vmatpush3.bf16.msra.mxu0 %v1423_v5  ;;  %1388 = vmatpush3.bf16.msra.mxu1 %v1423_v5  ;;  %s1582_s15 = scalar_lea.vmem %s1790_s0, %s1233_s10  ;;  %s1659_s21 = scalar_lea.vmem %s1794_s4, %s1148_s12 }
  0x11   : > { %1272 = vmatprep.subr.bf16.mxu0 %v1424_v6  ;;  %1381 = vmatprep.subr.bf16.mxu1 %v1424_v6  ;;  %v1436_v11 = vld [vmem:[%s1582_s15 + $0x4] ss:$8 sps:$4 sm:$0xff]   ;;  %v1434_v18 = vld [vmem:[%s1582_s15] ss:$8 sps:$4 sm:$0xff]   ;;  %v1440_v20 = vld [vmem:[%s1582_s15 + $0x14] ss:$8 sps:$4 sm:$0xff]  }
  0x12   : > { %v1439_v12 = vld [vmem:[%s1582_s15 + $0x84] ss:$8 sps:$4 sm:$0xff]   ;;  %622 = vmatprep.mubr.bf16.mxu0 %v1436_v11  ;;  %v1437_v19 = vld [vmem:[%s1582_s15 + $0x80] ss:$8 sps:$4 sm:$0xff]   ;;  %v1442_v21 = vld [vmem:[%s1582_s15 + $0x94] ss:$8 sps:$4 sm:$0xff]  }
  0x13   : > { %686 = vmatprep.mubr.bf16.mxu1 %v1439_v12  ;;  %v1444_v22 = vld [vmem:[%s1582_s15 + $0x10] ss:$8 sps:$4 sm:$0xff]   ;;  %v1446_v24 = vld [vmem:[%s1582_s15 + $0x24] ss:$8 sps:$4 sm:$0xff]   ;;  %v1450_v26 = vld [vmem:[%s1582_s15 + $0x20] ss:$8 sps:$4 sm:$0xff]  }
  0x14   : > { %1273 = vmatpush3.bf16.msra.mxu0 %v1425_v7  ;;  %1389 = vmatpush3.bf16.msra.mxu1 %v1425_v7  ;;  %v1445_v23 = vld [vmem:[%s1582_s15 + $0x90] ss:$8 sps:$4 sm:$0xff]   ;;  %v1448_v25 = vld [vmem:[%s1582_s15 + $0xa4] ss:$8 sps:$4 sm:$0xff]   ;;  %v1451_v27 = vld [vmem:[%s1582_s15 + $0xa0] ss:$8 sps:$4 sm:$0xff]  }
  0x15   : > { %1274 = vmatprep.subr.bf16.mxu0 %v1426_v8  ;;  %1382 = vmatprep.subr.bf16.mxu1 %v1426_v8  ;;  %v1452_v28 = vld [vmem:[%s1582_s15 + $0x34] ss:$8 sps:$4 sm:$0xff]   ;;  %v1456_v30 = vld [vmem:[%s1582_s15 + $0x30] ss:$8 sps:$4 sm:$0xff]   ;;  %v1458_v32 = vld [vmem:[%s1582_s15 + $0x44] ss:$8 sps:$4 sm:$0xff]  }
  0x16   : > { %v1454_v29 = vld [vmem:[%s1582_s15 + $0xb4] ss:$8 sps:$4 sm:$0xff]   ;;  %v1457_v31 = vld [vmem:[%s1582_s15 + $0xb0] ss:$8 sps:$4 sm:$0xff]   ;;  %v1460_v33 = vld [vmem:[%s1582_s15 + $0xc4] ss:$8 sps:$4 sm:$0xff]  }
  0x17   : > { %v1462_v34 = vld [vmem:[%s1582_s15 + $0x40] ss:$8 sps:$4 sm:$0xff]   ;;  %v1464_v36 = vld [vmem:[%s1582_s15 + $0x54] ss:$8 sps:$4 sm:$0xff]   ;;  %v1468_v38 = vld [vmem:[%s1582_s15 + $0x50] ss:$8 sps:$4 sm:$0xff]  }
  0x18   : > { %1275 = vmatpush3.bf16.msra.mxu0 %v1427_v9  ;;  %1390 = vmatpush3.bf16.msra.mxu1 %v1427_v9  ;;  %v1463_v35 = vld [vmem:[%s1582_s15 + $0xc0] ss:$8 sps:$4 sm:$0xff]   ;;  %v1466_v37 = vld [vmem:[%s1582_s15 + $0xd4] ss:$8 sps:$4 sm:$0xff]   ;;  %v1469_v39 = vld [vmem:[%s1582_s15 + $0xd0] ss:$8 sps:$4 sm:$0xff]  }
  0x19   : > { %1276 = vmatprep.subr.bf16.mxu0 %v1428_v10  ;;  %1383 = vmatprep.subr.bf16.mxu1 %v1428_v10  ;;  %v1470_v40 = vld [vmem:[%s1582_s15 + $0x64] ss:$8 sps:$4 sm:$0xff]   ;;  %v1474_v42 = vld [vmem:[%s1582_s15 + $0x60] ss:$8 sps:$4 sm:$0xff]   ;;  %v1476_v44 = vld [vmem:[%s1582_s15 + $0x74] ss:$8 sps:$4 sm:$0xff]  }
  0x1a   : > { %v1472_v41 = vld [vmem:[%s1582_s15 + $0xe4] ss:$8 sps:$4 sm:$0xff]   ;;  %v1475_v43 = vld [vmem:[%s1582_s15 + $0xe0] ss:$8 sps:$4 sm:$0xff]   ;;  %v1478_v45 = vld [vmem:[%s1582_s15 + $0xf4] ss:$8 sps:$4 sm:$0xff]  }
  0x1b   : > { %v1480_v46 = vld [vmem:[%s1582_s15 + $0x70] ss:$8 sps:$4 sm:$0xff]  }
  0x1c   : > { %1277 = vmatpush3.bf16.msra.mxu0 %v1429_v13  ;;  %1391 = vmatpush3.bf16.msra.mxu1 %v1429_v13  ;;  %v1481_v47 = vld [vmem:[%s1582_s15 + $0xf0] ss:$8 sps:$4 sm:$0xff]  }
  0x1d   : > { %1278 = vmatprep.subr.bf16.mxu0 %v1430_v14  ;;  %1384 = vmatprep.subr.bf16.mxu1 %v1430_v14 }
  0x20   : > { %1279 = vmatpush3.bf16.msra.mxu0 %v1431_v15  ;;  %1392 = vmatpush3.bf16.msra.mxu1 %v1431_v15 }
  0x21   : > { %1280 = vmatprep.subr.bf16.mxu0 %v1432_v16  ;;  %1385 = vmatprep.subr.bf16.mxu1 %v1432_v16 }
  0x24   : > { %1281 = vmatpush3.bf16.msra.mxu0 %v1433_v17  ;;  %1393 = vmatpush3.bf16.msra.mxu1 %v1433_v17 }
  0x27   : > { %623 = vmatmul.mubr.bf16.vlgmr.msra.gmra.mrb[0].mxu0 %v1434_v18  ;;  %687 = vmatmul.mubr.bf16.vlgmr.msra.gmra.mrb[0].mxu1 %v1437_v19 }
  0x28   : > { %630 = vmatprep.mubr.bf16.mxu0 %v1440_v20  ;;  %694 = vmatprep.mubr.bf16.mxu1 %v1442_v21 }
  0x2f   : > { %631 = vmatmul.mubr.bf16.gmra.mrb[4].mxu0 %v1444_v22  ;;  %695 = vmatmul.mubr.bf16.gmra.mrb[4].mxu1 %v1445_v23 }
  0x30   : > { %638 = vmatprep.mubr.bf16.mxu0 %v1446_v24  ;;  %702 = vmatprep.mubr.bf16.mxu1 %v1448_v25 }
  0x37   : > { %639 = vmatmul.mubr.bf16.gmra.mrb[8].mxu0 %v1450_v26  ;;  %703 = vmatmul.mubr.bf16.gmra.mrb[8].mxu1 %v1451_v27 }
  0x38   : > { %646 = vmatprep.mubr.bf16.mxu0 %v1452_v28  ;;  %710 = vmatprep.mubr.bf16.mxu1 %v1454_v29 }
  0x3f   : > { %647 = vmatmul.mubr.bf16.gmra.mrb[12].mxu0 %v1456_v30  ;;  %711 = vmatmul.mubr.bf16.gmra.mrb[12].mxu1 %v1457_v31 }
  0x40   : > { %654 = vmatprep.mubr.bf16.mxu0 %v1458_v32  ;;  %718 = vmatprep.mubr.bf16.mxu1 %v1460_v33 }
  0x47   : > { %655 = vmatmul.mubr.bf16.gmra.mrb[16].mxu0 %v1462_v34  ;;  %719 = vmatmul.mubr.bf16.gmra.mrb[16].mxu1 %v1463_v35 }
  0x48   : > { %662 = vmatprep.mubr.bf16.mxu0 %v1464_v36  ;;  %726 = vmatprep.mubr.bf16.mxu1 %v1466_v37 }
  0x4f   : > { %663 = vmatmul.mubr.bf16.gmra.mrb[20].mxu0 %v1468_v38  ;;  %727 = vmatmul.mubr.bf16.gmra.mrb[20].mxu1 %v1469_v39 }
  0x50   : > { %670 = vmatprep.mubr.bf16.mxu0 %v1470_v40  ;;  %734 = vmatprep.mubr.bf16.mxu1 %v1472_v41 }
  0x57   : > { %671 = vmatmul.mubr.bf16.gmra.mrb[24].mxu0 %v1474_v42  ;;  %735 = vmatmul.mubr.bf16.gmra.mrb[24].mxu1 %v1475_v43 }
  0x58   : > { %678 = vmatprep.mubr.bf16.mxu0 %v1476_v44  ;;  %742 = vmatprep.mubr.bf16.mxu1 %v1478_v45 }
  0x5f   : > { %679 = vmatmul.mubr.bf16.gmra.mrb[28].mxu0 %v1480_v46  ;;  %743 = vmatmul.mubr.bf16.gmra.mrb[28].mxu1 %v1481_v47 }
  0xfa   : > { %v1282_v48 = vpop.f32.mrb[0].mxu0  ;;  %v1330_v49 = vpop.f32.mrb[0].mxu1 }
  0xfb   : > { %v1283_v50 = vpop.f32.mrb[1].mxu0  ;;  %v1331_v52 = vpop.f32.mrb[1].mxu1 }
  0xfc   : > { %v1284_v53 = vadd.f32 %v1283_v50, %v1282_v48  ;;  %v1332_v54 = vadd.f32 %v1331_v52, %v1330_v49  ;;  %v1285_v55 = vpop.f32.mrb[2].mxu0  ;;  %v1333_v56 = vpop.f32.mrb[2].mxu1 }
  0xfd   : > { %v1286_v58 = vpop.f32.mrb[3].mxu0  ;;  %v1334_v59 = vpop.f32.mrb[3].mxu1 }
  0xfe   : > { %v758_v60 = vmul.f32 %v1284_v53, %v1640_v51  ;;  %v774_v61 = vmul.f32 %v1332_v54, %v1640_v51  ;;  %v1287_v62 = vadd.f32 %v1286_v58, %v1285_v55  ;;  %v1335_v63 = vadd.f32 %v1334_v59, %v1333_v56 }
 0x100   : > { %v797_v0 = vadd.f32 %v1645_v57, %v758_v60  ;;  %v813_v1 = vadd.f32 %v1645_v57, %v774_v61  ;;  %v759_v2 = vmul.f32 %v1287_v62, %v1640_v51  ;;  %v775_v3 = vmul.f32 %v1335_v63, %v1640_v51 }
 0x102   : > { %v829_v4 = vmax.f32 %v797_v0, 0.0  ;;  %v845_v5 = vmax.f32 %v813_v1, 0.0  ;;  %v798_v6 = vadd.f32 %v1645_v57, %v759_v2  ;;  %v814_v7 = vadd.f32 %v1645_v57, %v775_v3  ;;  %v1288_v8 = vpop.f32.mrb[4].mxu0  ;;  %v1336_v9 = vpop.f32.mrb[4].mxu1 }
 0x103   : > { %v1289_v10 = vpop.f32.mrb[5].mxu0  ;;  %v1337_v11 = vpop.f32.mrb[5].mxu1 }
 0x104   : > { %v1234_v12 = vpack.c.bf16 %v829_v4, %v829_v4  ;;  %v1250_v13 = vpack.c.bf16 %v845_v5, %v845_v5  ;;  %v830_v14 = vmax.f32 %v798_v6, 0.0  ;;  %v846_v15 = vmax.f32 %v814_v7, 0.0  ;;  %v1291_v16 = vpop.f32.mrb[6].mxu0  ;;  %v1339_v17 = vpop.f32.mrb[6].mxu1 }
 0x105   : > { %v1290_v18 = vadd.f32 %v1289_v10, %v1288_v8  ;;  %v1338_v19 = vadd.f32 %v1337_v11, %v1336_v9  ;;  %v1292_v20 = vpop.f32.mrb[7].mxu0  ;;  %v1340_v21 = vpop.f32.mrb[7].mxu1 }
 0x106   : > { %990 = vst.msk [vmem:[%s1659_s21] sm:$0xf] %vm989_vm0, %v1234_v12  ;;  %1006 = vst.msk [vmem:[%s1659_s21 + $0x40] sm:$0xf] %vm989_vm0, %v1250_v13  ;;  %v1235_v22 = vpack.c.bf16 %v830_v14, %v830_v14  ;;  %v1251_v23 = vpack.c.bf16 %v846_v15, %v846_v15  ;;  %v1293_v24 = vadd.f32 %v1292_v20, %v1291_v16 }
 0x107   : > { %v1341_v25 = vadd.f32 %v1340_v21, %v1339_v17  ;;  %v760_v26 = vmul.f32 %v1290_v18, %v1640_v51  ;;  %v776_v27 = vmul.f32 %v1338_v19, %v1640_v51 }
 0x108   : > { %991 = vst.msk [vmem:[%s1659_s21 + $0x4] sm:$0xf] %vm989_vm0, %v1235_v22  ;;  %1007 = vst.msk [vmem:[%s1659_s21 + $0x44] sm:$0xf] %vm989_vm0, %v1251_v23  ;;  %v761_v28 = vmul.f32 %v1293_v24, %v1640_v51 }
 0x109   : > { %v777_v29 = vmul.f32 %v1341_v25, %v1640_v51  ;;  %v799_v30 = vadd.f32 %v1645_v57, %v760_v26  ;;  %v815_v31 = vadd.f32 %v1645_v57, %v776_v27 }
 0x10a   : > { %v800_v32 = vadd.f32 %v1645_v57, %v761_v28  ;;  %v1294_v34 = vpop.f32.mrb[8].mxu0  ;;  %v1342_v35 = vpop.f32.mrb[8].mxu1 }
 0x10b   : > { %v816_v33 = vadd.f32 %v1645_v57, %v777_v29  ;;  %v831_v36 = vmax.f32 %v799_v30, 0.0  ;;  %v847_v37 = vmax.f32 %v815_v31, 0.0  ;;  %v1295_v38 = vpop.f32.mrb[9].mxu0  ;;  %v1343_v39 = vpop.f32.mrb[9].mxu1 }
 0x10c   : > { %v832_v40 = vmax.f32 %v800_v32, 0.0  ;;  %v1296_v42 = vadd.f32 %v1295_v38, %v1294_v34  ;;  %v1344_v43 = vadd.f32 %v1343_v39, %v1342_v35  ;;  %v1297_v44 = vpop.f32.mrb[10].mxu0  ;;  %v1345_v45 = vpop.f32.mrb[10].mxu1 }
 0x10d   : > { %v848_v41 = vmax.f32 %v816_v33, 0.0  ;;  %v1236_v46 = vpack.c.bf16 %v831_v36, %v831_v36  ;;  %v1252_v47 = vpack.c.bf16 %v847_v37, %v847_v37  ;;  %v1298_v48 = vpop.f32.mrb[11].mxu0  ;;  %v1346_v49 = vpop.f32.mrb[11].mxu1 }
 0x10e   : > { %v1237_v50 = vpack.c.bf16 %v832_v40, %v832_v40  ;;  %v762_v53 = vmul.f32 %v1296_v42, %v1640_v51  ;;  %v778_v54 = vmul.f32 %v1344_v43, %v1640_v51  ;;  %v1299_v55 = vadd.f32 %v1298_v48, %v1297_v44 }
 0x10f   : > { %v1253_v52 = vpack.c.bf16 %v848_v41, %v848_v41  ;;  %992 = vst.msk [vmem:[%s1659_s21 + $0x8] sm:$0xf] %vm989_vm0, %v1236_v46  ;;  %1008 = vst.msk [vmem:[%s1659_s21 + $0x48] sm:$0xf] %vm989_vm0, %v1252_v47  ;;  %v1347_v56 = vadd.f32 %v1346_v49, %v1345_v45 }
 0x110   : > { %993 = vst.msk [vmem:[%s1659_s21 + $0xc] sm:$0xf] %vm989_vm0, %v1237_v50  ;;  %v801_v58 = vadd.f32 %v1645_v57, %v762_v53  ;;  %v817_v59 = vadd.f32 %v1645_v57, %v778_v54  ;;  %v763_v60 = vmul.f32 %v1299_v55, %v1640_v51 }
 0x111   : > { %1009 = vst.msk [vmem:[%s1659_s21 + $0x4c] sm:$0xf] %vm989_vm0, %v1253_v52  ;;  %v779_v61 = vmul.f32 %v1347_v56, %v1640_v51 }
 0x112   : > { %v833_v62 = vmax.f32 %v801_v58, 0.0  ;;  %v849_v63 = vmax.f32 %v817_v59, 0.0  ;;  %v1300_v0 = vpop.f32.mrb[12].mxu0  ;;  %v1348_v1 = vpop.f32.mrb[12].mxu1  ;;  %v802_v2 = vadd.f32 %v1645_v57, %v763_v60 }
 0x113   : > { %v818_v3 = vadd.f32 %v1645_v57, %v779_v61  ;;  %v1301_v4 = vpop.f32.mrb[13].mxu0  ;;  %v1349_v5 = vpop.f32.mrb[13].mxu1 }
 0x114   : > { %v1238_v6 = vpack.c.bf16 %v833_v62, %v833_v62  ;;  %v1254_v7 = vpack.c.bf16 %v849_v63, %v849_v63  ;;  %v1302_v8 = vadd.f32 %v1301_v4, %v1300_v0  ;;  %v1350_v9 = vadd.f32 %v1349_v5, %v1348_v1  ;;  %v1303_v10 = vpop.f32.mrb[14].mxu0  ;;  %v1351_v11 = vpop.f32.mrb[14].mxu1 }
 0x115   : > { %v834_v12 = vmax.f32 %v802_v2, 0.0  ;;  %v850_v13 = vmax.f32 %v818_v3, 0.0  ;;  %v1304_v14 = vpop.f32.mrb[15].mxu0  ;;  %v1352_v15 = vpop.f32.mrb[15].mxu1 }
 0x116   : > { %994 = vst.msk [vmem:[%s1659_s21 + $0x10] sm:$0xf] %vm989_vm0, %v1238_v6  ;;  %1010 = vst.msk [vmem:[%s1659_s21 + $0x50] sm:$0xf] %vm989_vm0, %v1254_v7  ;;  %v764_v16 = vmul.f32 %v1302_v8, %v1640_v51  ;;  %v780_v17 = vmul.f32 %v1350_v9, %v1640_v51  ;;  %v1305_v18 = vadd.f32 %v1304_v14, %v1303_v10 }
 0x117   : > { %v1353_v19 = vadd.f32 %v1352_v15, %v1351_v11  ;;  %v1239_v20 = vpack.c.bf16 %v834_v12, %v834_v12  ;;  %v1255_v21 = vpack.c.bf16 %v850_v13, %v850_v13 }
 0x118   : > { %v803_v22 = vadd.f32 %v1645_v57, %v764_v16  ;;  %v819_v23 = vadd.f32 %v1645_v57, %v780_v17  ;;  %v765_v24 = vmul.f32 %v1305_v18, %v1640_v51 }
 0x119   : > { %v781_v25 = vmul.f32 %v1353_v19, %v1640_v51  ;;  %995 = vst.msk [vmem:[%s1659_s21 + $0x14] sm:$0xf] %vm989_vm0, %v1239_v20  ;;  %1011 = vst.msk [vmem:[%s1659_s21 + $0x54] sm:$0xf] %vm989_vm0, %v1255_v21 }
 0x11a   : > { %v835_v26 = vmax.f32 %v803_v22, 0.0  ;;  %v851_v27 = vmax.f32 %v819_v23, 0.0  ;;  %v804_v28 = vadd.f32 %v1645_v57, %v765_v24  ;;  %v1306_v30 = vpop.f32.mrb[16].mxu0  ;;  %v1354_v31 = vpop.f32.mrb[16].mxu1 }
 0x11b   : > { %v820_v29 = vadd.f32 %v1645_v57, %v781_v25  ;;  %v1307_v32 = vpop.f32.mrb[17].mxu0  ;;  %v1355_v33 = vpop.f32.mrb[17].mxu1 }
 0x11c   : > { %v1240_v34 = vpack.c.bf16 %v835_v26, %v835_v26  ;;  %v1256_v35 = vpack.c.bf16 %v851_v27, %v851_v27  ;;  %v836_v36 = vmax.f32 %v804_v28, 0.0  ;;  %v1309_v38 = vpop.f32.mrb[18].mxu0  ;;  %v1357_v39 = vpop.f32.mrb[18].mxu1  ;;  %v1308_v40 = vadd.f32 %v1307_v32, %v1306_v30 }
 0x11d   : > { %v852_v37 = vmax.f32 %v820_v29, 0.0  ;;  %v1356_v41 = vadd.f32 %v1355_v33, %v1354_v31  ;;  %v1310_v42 = vpop.f32.mrb[19].mxu0  ;;  %v1358_v43 = vpop.f32.mrb[19].mxu1 }
 0x11e   : > { %996 = vst.msk [vmem:[%s1659_s21 + $0x18] sm:$0xf] %vm989_vm0, %v1240_v34  ;;  %1012 = vst.msk [vmem:[%s1659_s21 + $0x58] sm:$0xf] %vm989_vm0, %v1256_v35  ;;  %v1241_v44 = vpack.c.bf16 %v836_v36, %v836_v36  ;;  %v1311_v46 = vadd.f32 %v1310_v42, %v1309_v38  ;;  %v1359_v47 = vadd.f32 %v1358_v43, %v1357_v39 }
 0x11f   : > { %v1257_v45 = vpack.c.bf16 %v852_v37, %v852_v37  ;;  %v766_v48 = vmul.f32 %v1308_v40, %v1640_v51  ;;  %v782_v49 = vmul.f32 %v1356_v41, %v1640_v51 }
 0x120   : > { %997 = vst.msk [vmem:[%s1659_s21 + $0x1c] sm:$0xf] %vm989_vm0, %v1241_v44  ;;  %v767_v50 = vmul.f32 %v1311_v46, %v1640_v51  ;;  %v783_v52 = vmul.f32 %v1359_v47, %v1640_v51 }
 0x121   : > { %1013 = vst.msk [vmem:[%s1659_s21 + $0x5c] sm:$0xf] %vm989_vm0, %v1257_v45  ;;  %v805_v53 = vadd.f32 %v1645_v57, %v766_v48  ;;  %v821_v54 = vadd.f32 %v1645_v57, %v782_v49 }
 0x122   : > { %v806_v55 = vadd.f32 %v1645_v57, %v767_v50  ;;  %v822_v56 = vadd.f32 %v1645_v57, %v783_v52  ;;  %v1312_v58 = vpop.f32.mrb[20].mxu0  ;;  %v1360_v59 = vpop.f32.mrb[20].mxu1 }
 0x123   : > { %v837_v60 = vmax.f32 %v805_v53, 0.0  ;;  %v853_v61 = vmax.f32 %v821_v54, 0.0  ;;  %v1313_v62 = vpop.f32.mrb[21].mxu0  ;;  %v1361_v63 = vpop.f32.mrb[21].mxu1 }
 0x124   : > { %v838_v0 = vmax.f32 %v806_v55, 0.0  ;;  %v854_v1 = vmax.f32 %v822_v56, 0.0  ;;  %v1314_v2 = vadd.f32 %v1313_v62, %v1312_v58  ;;  %v1362_v3 = vadd.f32 %v1361_v63, %v1360_v59  ;;  %v1315_v4 = vpop.f32.mrb[22].mxu0  ;;  %v1363_v5 = vpop.f32.mrb[22].mxu1 }
 0x125   : > { %v1242_v6 = vpack.c.bf16 %v837_v60, %v837_v60  ;;  %v1258_v7 = vpack.c.bf16 %v853_v61, %v853_v61  ;;  %v1316_v8 = vpop.f32.mrb[23].mxu0  ;;  %v1364_v9 = vpop.f32.mrb[23].mxu1 }
 0x126   : > { %v1243_v10 = vpack.c.bf16 %v838_v0, %v838_v0  ;;  %v1259_v11 = vpack.c.bf16 %v854_v1, %v854_v1  ;;  %v768_v12 = vmul.f32 %v1314_v2, %v1640_v51  ;;  %v784_v13 = vmul.f32 %v1362_v3, %v1640_v51 }
 0x127   : > { %998 = vst.msk [vmem:[%s1659_s21 + $0x20] sm:$0xf] %vm989_vm0, %v1242_v6  ;;  %1014 = vst.msk [vmem:[%s1659_s21 + $0x60] sm:$0xf] %vm989_vm0, %v1258_v7  ;;  %v1317_v14 = vadd.f32 %v1316_v8, %v1315_v4  ;;  %v1365_v15 = vadd.f32 %v1364_v9, %v1363_v5 }
 0x128   : > { %999 = vst.msk [vmem:[%s1659_s21 + $0x24] sm:$0xf] %vm989_vm0, %v1243_v10  ;;  %1015 = vst.msk [vmem:[%s1659_s21 + $0x64] sm:$0xf] %vm989_vm0, %v1259_v11  ;;  %v807_v16 = vadd.f32 %v1645_v57, %v768_v12  ;;  %v823_v17 = vadd.f32 %v1645_v57, %v784_v13 }
 0x129   : > { %v769_v18 = vmul.f32 %v1317_v14, %v1640_v51  ;;  %v785_v19 = vmul.f32 %v1365_v15, %v1640_v51 }
 0x12a   : > { %v839_v20 = vmax.f32 %v807_v16, 0.0  ;;  %v855_v21 = vmax.f32 %v823_v17, 0.0  ;;  %v1318_v22 = vpop.f32.mrb[24].mxu0  ;;  %v1366_v23 = vpop.f32.mrb[24].mxu1 }
 0x12b   : > { %v808_v24 = vadd.f32 %v1645_v57, %v769_v18  ;;  %v824_v25 = vadd.f32 %v1645_v57, %v785_v19  ;;  %v1319_v26 = vpop.f32.mrb[25].mxu0  ;;  %v1367_v27 = vpop.f32.mrb[25].mxu1 }
 0x12c   : > { %v1244_v28 = vpack.c.bf16 %v839_v20, %v839_v20  ;;  %v1260_v29 = vpack.c.bf16 %v855_v21, %v855_v21  ;;  %v1320_v30 = vadd.f32 %v1319_v26, %v1318_v22  ;;  %v1368_v31 = vadd.f32 %v1367_v27, %v1366_v23  ;;  %v1321_v32 = vpop.f32.mrb[26].mxu0  ;;  %v1369_v33 = vpop.f32.mrb[26].mxu1 }
 0x12d   : > { %v840_v34 = vmax.f32 %v808_v24, 0.0  ;;  %v856_v35 = vmax.f32 %v824_v25, 0.0  ;;  %v1322_v36 = vpop.f32.mrb[27].mxu0  ;;  %v1370_v37 = vpop.f32.mrb[27].mxu1 }
 0x12e   : > { %1000 = vst.msk [vmem:[%s1659_s21 + $0x28] sm:$0xf] %vm989_vm0, %v1244_v28  ;;  %1016 = vst.msk [vmem:[%s1659_s21 + $0x68] sm:$0xf] %vm989_vm0, %v1260_v29  ;;  %v770_v38 = vmul.f32 %v1320_v30, %v1640_v51  ;;  %v786_v39 = vmul.f32 %v1368_v31, %v1640_v51  ;;  %v1323_v40 = vadd.f32 %v1322_v36, %v1321_v32 }
 0x12f   : > { %v1371_v41 = vadd.f32 %v1370_v37, %v1369_v33  ;;  %v1245_v42 = vpack.c.bf16 %v840_v34, %v840_v34  ;;  %v1261_v43 = vpack.c.bf16 %v856_v35, %v856_v35 }
 0x130   : > { %v809_v44 = vadd.f32 %v1645_v57, %v770_v38  ;;  %v825_v45 = vadd.f32 %v1645_v57, %v786_v39  ;;  %v771_v46 = vmul.f32 %v1323_v40, %v1640_v51 }
 0x131   : > { %v787_v47 = vmul.f32 %v1371_v41, %v1640_v51  ;;  %1001 = vst.msk [vmem:[%s1659_s21 + $0x2c] sm:$0xf] %vm989_vm0, %v1245_v42  ;;  %1017 = vst.msk [vmem:[%s1659_s21 + $0x6c] sm:$0xf] %vm989_vm0, %v1261_v43 }
 0x132   : > { %v841_v48 = vmax.f32 %v809_v44, 0.0  ;;  %v857_v49 = vmax.f32 %v825_v45, 0.0  ;;  %v810_v50 = vadd.f32 %v1645_v57, %v771_v46  ;;  %v1324_v53 = vpop.f32.mrb[28].mxu0  ;;  %v1372_v54 = vpop.f32.mrb[28].mxu1 }
 0x133   : > { %v826_v52 = vadd.f32 %v1645_v57, %v787_v47  ;;  %v1325_v55 = vpop.f32.mrb[29].mxu0  ;;  %v1373_v56 = vpop.f32.mrb[29].mxu1 }
 0x134   : > { %v1246_v58 = vpack.c.bf16 %v841_v48, %v841_v48  ;;  %v1262_v59 = vpack.c.bf16 %v857_v49, %v857_v49  ;;  %v842_v60 = vmax.f32 %v810_v50, 0.0  ;;  %v1327_v62 = vpop.f32.mrb[30].mxu0  ;;  %v1375_v63 = vpop.f32.mrb[30].mxu1  ;;  %v1326_v0 = vadd.f32 %v1325_v55, %v1324_v53 }
 0x135   : > { %v858_v61 = vmax.f32 %v826_v52, 0.0  ;;  %v1374_v1 = vadd.f32 %v1373_v56, %v1372_v54  ;;  %v1328_v2 = vpop.f32.mrb[31].mxu0  ;;  %v1376_v3 = vpop.f32.mrb[31].mxu1 }
 0x136   : > { %1002 = vst.msk [vmem:[%s1659_s21 + $0x30] sm:$0xf] %vm989_vm0, %v1246_v58  ;;  %1018 = vst.msk [vmem:[%s1659_s21 + $0x70] sm:$0xf] %vm989_vm0, %v1262_v59  ;;  %v1247_v4 = vpack.c.bf16 %v842_v60, %v842_v60  ;;  %v1329_v6 = vadd.f32 %v1328_v2, %v1327_v62  ;;  %v1377_v7 = vadd.f32 %v1376_v3, %v1375_v63 }
 0x137   : > { %v1263_v5 = vpack.c.bf16 %v858_v61, %v858_v61  ;;  %v772_v8 = vmul.f32 %v1326_v0, %v1640_v51  ;;  %v788_v9 = vmul.f32 %v1374_v1, %v1640_v51 }
 0x138   : > { %1003 = vst.msk [vmem:[%s1659_s21 + $0x34] sm:$0xf] %vm989_vm0, %v1247_v4  ;;  %v773_v10 = vmul.f32 %v1329_v6, %v1640_v51  ;;  %v789_v11 = vmul.f32 %v1377_v7, %v1640_v51 }
 0x139   : > { %1019 = vst.msk [vmem:[%s1659_s21 + $0x74] sm:$0xf] %vm989_vm0, %v1263_v5  ;;  %v811_v12 = vadd.f32 %v1645_v57, %v772_v8  ;;  %v827_v13 = vadd.f32 %v1645_v57, %v788_v9 }
 0x13a   : > { %v812_v14 = vadd.f32 %v1645_v57, %v773_v10  ;;  %v828_v15 = vadd.f32 %v1645_v57, %v789_v11 }
 0x13b   : > { %v843_v16 = vmax.f32 %v811_v12, 0.0  ;;  %v859_v17 = vmax.f32 %v827_v13, 0.0 }
 0x13c   : > { %v844_v18 = vmax.f32 %v812_v14, 0.0  ;;  %v860_v19 = vmax.f32 %v828_v15, 0.0 }
 0x13d   : > { %v1248_v20 = vpack.c.bf16 %v843_v16, %v843_v16  ;;  %v1264_v21 = vpack.c.bf16 %v859_v17, %v859_v17 }
 0x13e   : > { %v1249_v22 = vpack.c.bf16 %v844_v18, %v844_v18  ;;  %v1265_v23 = vpack.c.bf16 %v860_v19, %v860_v19 }
 0x13f   : > { %1004 = vst.msk [vmem:[%s1659_s21 + $0x38] sm:$0xf] %vm989_vm0, %v1248_v20  ;;  %1020 = vst.msk [vmem:[%s1659_s21 + $0x78] sm:$0xf] %vm989_vm0, %v1264_v21 }
 0x140   : > { %1005 = vst.msk [vmem:[%s1659_s21 + $0x3c] sm:$0xf] %vm989_vm0, %v1249_v22  ;;  %1021 = vst.msk [vmem:[%s1659_s21 + $0x7c] sm:$0xf] %vm989_vm0, %v1265_v23 }
 0x141 PF: > { %s14_s17 = sadd.s32 1, %s1504_s17   ;;  %s1795_s15 = smov %s1500_s16 }
 0x142   : > { %p11_p5 = scmp.ge.s32.totalorder %s14_s17, 4   ;;  %s1796_s16 = smov %s1798_s18 }
 0x144   :  { %13 = sbr.rel (!%p11_p5) target bundleno = 2 (0x2), region = 75 }

// kernel: densenet121_forward.16
= control target key start
LH: loop header
LB: loop body
LE: loop exit
PB: predicated region body
PF: predicated region fallthrough
CT: control target
= control target key end

     0   :  { %s1980_s9 = smov 0   ;;  %s1982_s10 = smov 0   ;;  %s2285_s0 = inlined_call_operand.vmem [shape: bf16[128,1152], index: 0, kind: input, shape index: {}]   ;;  %s2286_s1 = inlined_call_operand.vmem [shape: bf16[1152,32], index: 1, kind: input, shape index: {}]   ;;  %s2287_s2 = inlined_call_operand.vmem [shape: bf16[128,32], index: 2, kind: output, shape index: {}]  }
   0x1   :  { %s1984_s11 = smov 0  }
   0x2 LB: > { %s24_s12 = sadd.s32 1, %s1959_s10  ;;  %p1449_p0 = scmp.ge.s32.totalorder %s1963_s11, 1  ;;  %s1963_s11 = sphi %s1984_s11, %s12_s11   ;;  %s1959_s10 = sphi %s1982_s10, %s2289_s10   ;;  %s1955_s9 = sphi %s1980_s9, %s2288_s9  }
   0x3   : > { %p26_p1 = scmp.ge.s32.totalorder %s24_s12, 2  ;;  %p137_p2 = scmp.lt.s32.totalorder %s1963_s11, 3 }
   0x5   : > { %s2291_s12 = smov (%p26_p1, %s24_s12), 0  ;;  %p138_p3 = pnand %p1449_p0, %p137_p2 }
   0x6   : > { %v1817_v0 = vld [vmem:[%s2286_s1 + $0x40] sm:$0xff] (!%p138_p3)   ;;  %v1821_v4 = vld [vmem:[%s2286_s1 + $0x48] sm:$0xff] (!%p138_p3)   ;;  %v1825_v8 = vld [vmem:[%s2286_s1 + $0x50] sm:$0xff] (!%p138_p3)   ;;  %s1450_s19 = sshll.u32 (!%p138_p3), %s1955_s9, 3  ;;  %vm1345_vm0 = vcmask (!%p138_p3), 257024  }
   0x7   : > { %141 = sbr.rel (%p138_p3) target bundleno = 326 (0x146), region = 28  ;;  %v1818_v1 = vld [vmem:[%s2286_s1 + $0xc0] sm:$0xff] (!%p138_p3)   ;;  %1580 = vmatprep.subr.bf16.mxu0 (!%p138_p3), %v1817_v0  ;;  %v1822_v5 = vld [vmem:[%s2286_s1 + $0xc8] sm:$0xff] (!%p138_p3)   ;;  %v1826_v9 = vld [vmem:[%s2286_s1 + $0xd0] sm:$0xff] (!%p138_p3)   ;;  %p168_p4 = scmp.lt.s32.totalorder (!%p138_p3), %s1450_s19, 15 }
   0x8   : > { %v1819_v2 = vld [vmem:[%s2286_s1] sm:$0xff] (!%p138_p3)   ;;  %1620 = vmatprep.subr.bf16.mxu1 (!%p138_p3), %v1818_v1  ;;  %v1823_v6 = vld [vmem:[%s2286_s1 + $0x8] sm:$0xff] (!%p138_p3)   ;;  %v1827_v10 = vld [vmem:[%s2286_s1 + $0x10] sm:$0xff] (!%p138_p3)  }
   0x9   : > { %v1820_v3 = vld [vmem:[%s2286_s1 + $0x80] sm:$0xff] (!%p138_p3)   ;;  %1581 = vmatpush3.bf16.msra.mxu0 (!%p138_p3), %v1819_v2  ;;  %v1824_v7 = vld [vmem:[%s2286_s1 + $0x88] sm:$0xff] (!%p138_p3)   ;;  %v1828_v11 = vld [vmem:[%s2286_s1 + $0x90] sm:$0xff] (!%p138_p3)  }
   0xa   : > { %1621 = vmatpush3.bf16.msra.mxu1 (!%p138_p3), %v1820_v3  ;;  %1582 = vmatprep.subr.bf16.mxu0 (!%p138_p3), %v1821_v4  ;;  %v1829_v12 = vld [vmem:[%s2286_s1 + $0x58] sm:$0xff] (!%p138_p3)   ;;  %v1833_v16 = vld [vmem:[%s2286_s1 + $0x60] sm:$0xff] (!%p138_p3)   ;;  %v1837_v20 = vld [vmem:[%s2286_s1 + $0x68] sm:$0xff] (!%p138_p3)  }
   0xb   : > { %1622 = vmatprep.subr.bf16.mxu1 (!%p138_p3), %v1822_v5  ;;  %v1830_v13 = vld [vmem:[%s2286_s1 + $0xd8] sm:$0xff] (!%p138_p3)   ;;  %v1834_v17 = vld [vmem:[%s2286_s1 + $0xe0] sm:$0xff] (!%p138_p3)   ;;  %v1838_v21 = vld [vmem:[%s2286_s1 + $0xe8] sm:$0xff] (!%p138_p3)  }
   0xc   : > { %v1831_v14 = vld [vmem:[%s2286_s1 + $0x18] sm:$0xff] (!%p138_p3)   ;;  %v1835_v18 = vld [vmem:[%s2286_s1 + $0x20] sm:$0xff] (!%p138_p3)   ;;  %v1839_v22 = vld [vmem:[%s2286_s1 + $0x28] sm:$0xff] (!%p138_p3)  }
   0xd   : > { %1583 = vmatpush3.bf16.msra.mxu0 (!%p138_p3), %v1823_v6  ;;  %v1832_v15 = vld [vmem:[%s2286_s1 + $0x98] sm:$0xff] (!%p138_p3)   ;;  %v1836_v19 = vld [vmem:[%s2286_s1 + $0xa0] sm:$0xff] (!%p138_p3)   ;;  %v1840_v23 = vld [vmem:[%s2286_s1 + $0xa8] sm:$0xff] (!%p138_p3)  }
   0xe   : > { %1623 = vmatpush3.bf16.msra.mxu1 %v1824_v7  ;;  %1584 = vmatprep.subr.bf16.mxu0 %v1825_v8  ;;  %s2293_s19 = smov (!%p168_p4, %s1450_s19), 15  ;;  %v1841_v24 = vld [vmem:[%s2286_s1 + $0x70] sm:$0xff]   ;;  %v1845_v28 = vld [vmem:[%s2286_s1 + $0x78] sm:$0xff]   ;;  %v1855_v36 = vld [vmem:[%s2286_s1 + $0x140] sm:$0xff]  }
   0xf   : > { %1624 = vmatprep.subr.bf16.mxu1 %v1826_v9  ;;  %v1842_v25 = vld [vmem:[%s2286_s1 + $0xf0] sm:$0xff]   ;;  %s1792_s17 = smul.u32 36, %s2293_s19  ;;  %v1846_v29 = vld [vmem:[%s2286_s1 + $0xf8] sm:$0xff]   ;;  %v1856_v37 = vld [vmem:[%s2286_s1 + $0x1c0] sm:$0xff]  }
  0x10   : > { %v1843_v26 = vld [vmem:[%s2286_s1 + $0x30] sm:$0xff]   ;;  %v1847_v30 = vld [vmem:[%s2286_s1 + $0x38] sm:$0xff]   ;;  %v1857_v38 = vld [vmem:[%s2286_s1 + $0x100] sm:$0xff]  }
  0x11   : > { %1585 = vmatpush3.bf16.msra.mxu0 %v1827_v10  ;;  %v1844_v27 = vld [vmem:[%s2286_s1 + $0xb0] sm:$0xff]   ;;  %s2097_s28 = scalar_lea.vmem %s2285_s0, %s1792_s17  ;;  %v1848_v31 = vld [vmem:[%s2286_s1 + $0xb8] sm:$0xff]   ;;  %v1858_v39 = vld [vmem:[%s2286_s1 + $0x180] sm:$0xff]  }
  0x12   : > { %1625 = vmatpush3.bf16.msra.mxu1 %v1828_v11  ;;  %1586 = vmatprep.subr.bf16.mxu0 %v1829_v12  ;;  %v1849_v32 = vld [vmem:[%s2097_s28] ss:$36 sps:$4 sm:$0xff]   ;;  %v1852_v34 = vld [vmem:[%s2097_s28 + $0x8] ss:$36 sps:$4 sm:$0xff]   ;;  %v1865_v45 = vld [vmem:[%s2097_s28 + $0x54] ss:$36 sps:$4 sm:$0xff]  }
  0x13   : > { %1626 = vmatprep.subr.bf16.mxu1 %v1830_v13  ;;  %v1851_v33 = vld [vmem:[%s2097_s28 + $0x4] ss:$36 sps:$4 sm:$0xff]   ;;  %v1854_v35 = vld [vmem:[%s2097_s28 + $0xc] ss:$36 sps:$4 sm:$0xff]   ;;  %v1873_v52 = vld [vmem:[%s2286_s1 + $0x158] sm:$0xff]  }
  0x14   : > { %1020 = vmatprep.mubr.bf16.mxu0 %v1851_v33  ;;  %1085 = vmatprep.mubr.bf16.mxu1 %v1854_v35  ;;  %v1859_v40 = vld [vmem:[%s2286_s1 + $0x148] sm:$0xff]   ;;  %v1868_v47 = vld [vmem:[%s2097_s28 + $0x50] ss:$36 sps:$4 sm:$0xff]   ;;  %v1874_v53 = vld [vmem:[%s2286_s1 + $0x1d8] sm:$0xff]  }
  0x15   : > { %1587 = vmatpush3.bf16.msra.mxu0 %v1831_v14  ;;  %v1860_v41 = vld [vmem:[%s2286_s1 + $0x1c8] sm:$0xff]   ;;  %v1869_v48 = vld [vmem:[%s2286_s1 + $0x150] sm:$0xff]   ;;  %v1875_v54 = vld [vmem:[%s2286_s1 + $0x118] sm:$0xff]  }
  0x16   : > { %1627 = vmatpush3.bf16.msra.mxu1 %v1832_v15  ;;  %1588 = vmatprep.subr.bf16.mxu0 %v1833_v16  ;;  %v1861_v42 = vld [vmem:[%s2286_s1 + $0x108] sm:$0xff]   ;;  %v1870_v49 = vld [vmem:[%s2286_s1 + $0x1d0] sm:$0xff]   ;;  %v1876_v55 = vld [vmem:[%s2286_s1 + $0x198] sm:$0xff]  }
  0x17   : > { %1628 = vmatprep.subr.bf16.mxu1 %v1834_v17  ;;  %v1862_v43 = vld [vmem:[%s2286_s1 + $0x188] sm:$0xff]   ;;  %v1871_v50 = vld [vmem:[%s2286_s1 + $0x110] sm:$0xff]   ;;  %v1879_v57 = vld [vmem:[%s2097_s28 + $0x9c] ss:$36 sps:$4 sm:$0xff]  }
  0x18   : > { %v1863_v44 = vld [vmem:[%s2097_s28 + $0x4c] ss:$36 sps:$4 sm:$0xff]   ;;  %v1877_v56 = vld [vmem:[%s2097_s28 + $0x94] ss:$36 sps:$4 sm:$0xff]   ;;  %v1883_v60 = vld [vmem:[%s2286_s1 + $0x160] sm:$0xff]  }
  0x19   : > { %1589 = vmatpush3.bf16.msra.mxu0 %v1835_v18  ;;  %v1867_v46 = vld [vmem:[%s2097_s28 + $0x48] ss:$36 sps:$4 sm:$0xff]   ;;  %v1872_v51 = vld [vmem:[%s2286_s1 + $0x190] sm:$0xff]   ;;  %v1882_v59 = vld [vmem:[%s2097_s28 + $0x98] ss:$36 sps:$4 sm:$0xff]  }
  0x1a   : > { %1629 = vmatpush3.bf16.msra.mxu1 %v1836_v19  ;;  %1590 = vmatprep.subr.bf16.mxu0 %v1837_v20  ;;  %v1881_v58 = vld [vmem:[%s2097_s28 + $0x90] ss:$36 sps:$4 sm:$0xff]   ;;  %v1884_v61 = vld [vmem:[%s2286_s1 + $0x1e0] sm:$0xff]   ;;  %v1887_v0 = vld [vmem:[%s2286_s1 + $0x168] sm:$0xff]  }
  0x1b   : > { %1630 = vmatprep.subr.bf16.mxu1 %v1838_v21  ;;  %v1885_v62 = vld [vmem:[%s2286_s1 + $0x120] sm:$0xff]   ;;  %v1888_v1 = vld [vmem:[%s2286_s1 + $0x1e8] sm:$0xff]   ;;  %v1895_v6 = vld [vmem:[%s2097_s28 + $0xd8] ss:$36 sps:$4 sm:$0xff]  }
  0x1c   : > { %v1886_v63 = vld [vmem:[%s2286_s1 + $0x1a0] sm:$0xff]   ;;  %v1889_v2 = vld [vmem:[%s2286_s1 + $0x128] sm:$0xff]   ;;  %v1897_v8 = vld [vmem:[%s2286_s1 + $0x170] sm:$0xff]  }
  0x1d   : > { %1591 = vmatpush3.bf16.msra.mxu0 %v1839_v22  ;;  %v1890_v3 = vld [vmem:[%s2286_s1 + $0x1a8] sm:$0xff]   ;;  %v1891_v4 = vld [vmem:[%s2097_s28 + $0xdc] ss:$36 sps:$4 sm:$0xff]   ;;  %v1898_v9 = vld [vmem:[%s2286_s1 + $0x1f0] sm:$0xff]  }
  0x1e   : > { %1631 = vmatpush3.bf16.msra.mxu1 %v1840_v23  ;;  %1592 = vmatprep.subr.bf16.mxu0 %v1841_v24  ;;  %v1893_v5 = vld [vmem:[%s2097_s28 + $0xe4] ss:$36 sps:$4 sm:$0xff]   ;;  %v1899_v10 = vld [vmem:[%s2286_s1 + $0x130] sm:$0xff]   ;;  %v1901_v12 = vld [vmem:[%s2286_s1 + $0x178] sm:$0xff]  }
  0x1f   : > { %1632 = vmatprep.subr.bf16.mxu1 %v1842_v25  ;;  %v1896_v7 = vld [vmem:[%s2097_s28 + $0xe0] ss:$36 sps:$4 sm:$0xff]   ;;  %v1900_v11 = vld [vmem:[%s2286_s1 + $0x1b0] sm:$0xff]   ;;  %v1902_v13 = vld [vmem:[%s2286_s1 + $0x1f8] sm:$0xff]  }
  0x20   : > { %v1903_v14 = vld [vmem:[%s2286_s1 + $0x138] sm:$0xff]   ;;  %v1905_v16 = vld [vmem:[%s2097_s28 + $0x10] ss:$36 sps:$4 sm:$0xff]   ;;  %v1911_v20 = vld [vmem:[%s2286_s1 + $0x200] sm:$0xff]  }
  0x21   : > { %1593 = vmatpush3.bf16.msra.mxu0 %v1843_v26  ;;  %v1904_v15 = vld [vmem:[%s2286_s1 + $0x1b8] sm:$0xff]   ;;  %v1912_v21 = vld [vmem:[%s2286_s1 + $0x208] sm:$0xff]   ;;  %v1918_v25 = vld [vmem:[%s2097_s28 + $0x60] ss:$36 sps:$4 sm:$0xff]  }
  0x22   : > { %1633 = vmatpush3.bf16.msra.mxu1 %v1844_v27  ;;  %1594 = vmatprep.subr.bf16.mxu0 %v1845_v28  ;;  %v1907_v17 = vld [vmem:[%s2097_s28 + $0x14] ss:$36 sps:$4 sm:$0xff]   ;;  %v1910_v19 = vld [vmem:[%s2097_s28 + $0x1c] ss:$36 sps:$4 sm:$0xff]   ;;  %v1915_v23 = vld [vmem:[%s2097_s28 + $0x64] ss:$36 sps:$4 sm:$0xff]  }
  0x23   : > { %1634 = vmatprep.subr.bf16.mxu1 %v1846_v29  ;;  %v1908_v18 = vld [vmem:[%s2097_s28 + $0x18] ss:$36 sps:$4 sm:$0xff]   ;;  %v1919_v26 = vld [vmem:[%s2286_s1 + $0x210] sm:$0xff]   ;;  %v1921_v27 = vld [vmem:[%s2097_s28 + $0xa4] ss:$36 sps:$4 sm:$0xff]  }
  0x24   : > { %v1913_v22 = vld [vmem:[%s2097_s28 + $0x5c] ss:$36 sps:$4 sm:$0xff]   ;;  %v1923_v28 = vld [vmem:[%s2097_s28 + $0xac] ss:$36 sps:$4 sm:$0xff]  }
  0x25   : > { %1595 = vmatpush3.bf16.msra.mxu0 %v1847_v30  ;;  %v1917_v24 = vld [vmem:[%s2097_s28 + $0x58] ss:$36 sps:$4 sm:$0xff]   ;;  %v1925_v30 = vld [vmem:[%s2097_s28 + $0xa0] ss:$36 sps:$4 sm:$0xff]   ;;  %v1929_v33 = vld [vmem:[%s2097_s28 + $0xec] ss:$36 sps:$4 sm:$0xff]  }
  0x26   : > { %1635 = vmatpush3.bf16.msra.mxu1 %v1848_v31  ;;  %1660 = vmatprep.subr.bf16.mxu0 %v1855_v36  ;;  %v1920_v29 = vld [vmem:[%s2286_s1 + $0x218] sm:$0xff]   ;;  %v1926_v31 = vld [vmem:[%s2097_s28 + $0xa8] ss:$36 sps:$4 sm:$0xff]  }
  0x27   : > { %1700 = vmatprep.subr.bf16.mxu1 %v1856_v37  ;;  %v1928_v35 = vld [vmem:[%s2286_s1 + $0x228] sm:$0xff]   ;;  %v1935_v37 = vld [vmem:[%s2286_s1 + $0x230] sm:$0xff]  }
  0x28   : > { %1021 = vmatmul.mubr.bf16.vlgmr.msra.gmra.mrb[0].mxu0 %v1849_v32  ;;  %v1927_v32 = vld [vmem:[%s2286_s1 + $0x220] sm:$0xff]   ;;  %v1933_v36 = vld [vmem:[%s2097_s28 + $0xe8] ss:$36 sps:$4 sm:$0xff]  }
  0x29   : > { %1086 = vmatmul.mubr.bf16.vlgmr.msra.gmra.mrb[0].mxu1 %v1852_v34  ;;  %1661 = vmatpush3.bf16.msra.mxu0 %v1857_v38  ;;  %v1931_v34 = vld [vmem:[%s2097_s28 + $0xf4] ss:$36 sps:$4 sm:$0xff]  }
  0x2a   : > { %1701 = vmatpush3.bf16.msra.mxu1 %v1858_v39  ;;  %1662 = vmatprep.subr.bf16.mxu0 %v1859_v40  ;;  %v1934_v38 = vld [vmem:[%s2097_s28 + $0xf0] ss:$36 sps:$4 sm:$0xff]   ;;  %v1937_v39 = vld [vmem:[%s2097_s28 + $0x20] ss:$36 sps:$4 sm:$0xff]  }
  0x2b   : > { %1702 = vmatprep.subr.bf16.mxu1 %v1860_v41  ;;  %1028 = vmatprep.mubr.bf16.mxu0 %v1863_v44  ;;  %v1938_v40 = vld [vmem:[%s2097_s28 + $0xb0] ss:$36 sps:$4 sm:$0xff]   ;;  %v1936_v41 = vld [vmem:[%s2286_s1 + $0x238] sm:$0xff]  }
  0x2c   : > { %1093 = vmatprep.mubr.bf16.mxu1 %v1865_v45 }
  0x2d   : > { %1663 = vmatpush3.bf16.msra.mxu0 %v1861_v42  ;;  %v1939_v42 = vld [vmem:[%s2097_s28 + $0x68] ss:$36 sps:$4 sm:$0xff]  }
  0x2e   : > { %1703 = vmatpush3.bf16.msra.mxu1 %v1862_v43  ;;  %1664 = vmatprep.subr.bf16.mxu0 %v1869_v48  ;;  %v1940_v43 = vld [vmem:[%s2097_s28 + $0xf8] ss:$36 sps:$4 sm:$0xff]   ;;  %s1453_s28 = sshll.u32 %s2293_s19, 2 }
  0x2f   : > { %1704 = vmatprep.subr.bf16.mxu1 %v1870_v49  ;;  %s185_s23 = scalar_lea.vmem %s2287_s2, %s1453_s28 }
  0x30   : > { %1029 = vmatmul.mubr.bf16.gmra.mrb[4].mxu0 %v1867_v46 }
  0x31   : > { %1094 = vmatmul.mubr.bf16.gmra.mrb[4].mxu1 %v1868_v47  ;;  %1665 = vmatpush3.bf16.msra.mxu0 %v1871_v50 }
  0x32   : > { %1705 = vmatpush3.bf16.msra.mxu1 %v1872_v51  ;;  %1666 = vmatprep.subr.bf16.mxu0 %v1873_v52 }
  0x33   : > { %1706 = vmatprep.subr.bf16.mxu1 %v1874_v53  ;;  %1036 = vmatprep.mubr.bf16.mxu0 %v1877_v56 }
  0x34   : > { %1101 = vmatprep.mubr.bf16.mxu1 %v1879_v57 }
  0x35   : > { %1667 = vmatpush3.bf16.msra.mxu0 %v1875_v54 }
  0x36   : > { %1707 = vmatpush3.bf16.msra.mxu1 %v1876_v55  ;;  %1668 = vmatprep.subr.bf16.mxu0 %v1883_v60 }
  0x37   : > { %1708 = vmatprep.subr.bf16.mxu1 %v1884_v61 }
  0x38   : > { %1037 = vmatmul.mubr.bf16.gmra.mrb[8].mxu0 %v1881_v58 }
  0x39   : > { %1102 = vmatmul.mubr.bf16.gmra.mrb[8].mxu1 %v1882_v59  ;;  %1669 = vmatpush3.bf16.msra.mxu0 %v1885_v62 }
  0x3a   : > { %1709 = vmatpush3.bf16.msra.mxu1 %v1886_v63  ;;  %1670 = vmatprep.subr.bf16.mxu0 %v1887_v0 }
  0x3b   : > { %1710 = vmatprep.subr.bf16.mxu1 %v1888_v1  ;;  %1044 = vmatprep.mubr.bf16.mxu0 %v1891_v4 }
  0x3c   : > { %1109 = vmatprep.mubr.bf16.mxu1 %v1893_v5 }
  0x3d   : > { %1671 = vmatpush3.bf16.msra.mxu0 %v1889_v2 }
  0x3e   : > { %1711 = vmatpush3.bf16.msra.mxu1 %v1890_v3  ;;  %1672 = vmatprep.subr.bf16.mxu0 %v1897_v8 }
  0x3f   : > { %1712 = vmatprep.subr.bf16.mxu1 %v1898_v9 }
  0x40   : > { %1045 = vmatmul.mubr.bf16.gmra.mrb[12].mxu0 %v1895_v6 }
  0x41   : > { %1110 = vmatmul.mubr.bf16.gmra.mrb[12].mxu1 %v1896_v7  ;;  %1673 = vmatpush3.bf16.msra.mxu0 %v1899_v10 }
  0x42   : > { %1713 = vmatpush3.bf16.msra.mxu1 %v1900_v11  ;;  %1674 = vmatprep.subr.bf16.mxu0 %v1901_v12 }
  0x43   : > { %1714 = vmatprep.subr.bf16.mxu1 %v1902_v13  ;;  %1150 = vmatprep.mubr.bf16.mxu0 %v1907_v17 }
  0x44   : > { %1215 = vmatprep.mubr.bf16.mxu1 %v1910_v19 }
  0x45   : > { %1675 = vmatpush3.bf16.msra.mxu0 %v1903_v14 }
  0x46   : > { %1715 = vmatpush3.bf16.msra.mxu1 %v1904_v15  ;;  %1752 = vmatprep.subr.bf16.mxu0 %v1911_v20 }
  0x47   : > { %1776 = vmatprep.subr.bf16.mxu1 %v1911_v20 }
  0x48   : > { %1151 = vmatmul.mubr.bf16.vlgmr.msra.gmra.mrb[16].mxu0 %v1905_v16 }
  0x49   : > { %1216 = vmatmul.mubr.bf16.vlgmr.msra.gmra.mrb[16].mxu1 %v1908_v18  ;;  %1753 = vmatpush3.bf16.msra.mxu0 %v1911_v20 }
  0x4a   : > { %1784 = vmatpush3.bf16.msra.mxu1 %v1911_v20  ;;  %1754 = vmatprep.subr.bf16.mxu0 %v1912_v21 }
  0x4b   : > { %1777 = vmatprep.subr.bf16.mxu1 %v1912_v21  ;;  %1158 = vmatprep.mubr.bf16.mxu0 %v1913_v22 }
  0x4c   : > { %1223 = vmatprep.mubr.bf16.mxu1 %v1915_v23 }
  0x4d   : > { %1755 = vmatpush3.bf16.msra.mxu0 %v1912_v21 }
  0x4e   : > { %1785 = vmatpush3.bf16.msra.mxu1 %v1912_v21  ;;  %1756 = vmatprep.subr.bf16.mxu0 %v1919_v26 }
  0x4f   : > { %1778 = vmatprep.subr.bf16.mxu1 %v1919_v26 }
  0x50   : > { %1159 = vmatmul.mubr.bf16.gmra.mrb[20].mxu0 %v1917_v24 }
  0x51   : > { %1224 = vmatmul.mubr.bf16.gmra.mrb[20].mxu1 %v1918_v25  ;;  %1166 = vmatprep.mubr.bf16.mxu0 %v1921_v27 }
  0x52   : > { %1757 = vmatpush3.bf16.msra.mxu0 %v1919_v26  ;;  %1231 = vmatprep.mubr.bf16.mxu1 %v1923_v28 }
  0x53   : > { %1786 = vmatpush3.bf16.msra.mxu1 %v1919_v26  ;;  %1758 = vmatprep.subr.bf16.mxu0 %v1920_v29 }
  0x54   : > { %1779 = vmatprep.subr.bf16.mxu1 %v1920_v29 }
  0x56   : > { %1759 = vmatpush3.bf16.msra.mxu0 %v1920_v29 }
  0x57   : > { %1787 = vmatpush3.bf16.msra.mxu1 %v1920_v29  ;;  %1760 = vmatprep.subr.bf16.mxu0 %v1927_v32 }
  0x58   : > { %1167 = vmatmul.mubr.bf16.gmra.mrb[24].mxu0 %v1925_v30  ;;  %1780 = vmatprep.subr.bf16.mxu1 %v1927_v32 }
  0x59   : > { %1232 = vmatmul.mubr.bf16.gmra.mrb[24].mxu1 %v1926_v31  ;;  %1174 = vmatprep.mubr.bf16.mxu0 %v1929_v33 }
  0x5a   : > { %1761 = vmatpush3.bf16.msra.mxu0 %v1927_v32  ;;  %1239 = vmatprep.mubr.bf16.mxu1 %v1931_v34 }
  0x5b   : > { %1788 = vmatpush3.bf16.msra.mxu1 %v1927_v32  ;;  %1762 = vmatprep.subr.bf16.mxu0 %v1928_v35 }
  0x5c   : > { %1781 = vmatprep.subr.bf16.mxu1 %v1928_v35 }
  0x5e   : > { %1763 = vmatpush3.bf16.msra.mxu0 %v1928_v35 }
  0x5f   : > { %1789 = vmatpush3.bf16.msra.mxu1 %v1928_v35  ;;  %1764 = vmatprep.subr.bf16.mxu0 %v1935_v37 }
  0x60   : > { %1175 = vmatmul.mubr.bf16.gmra.mrb[28].mxu0 %v1933_v36  ;;  %1782 = vmatprep.subr.bf16.mxu1 %v1935_v37 }
  0x61   : > { %1240 = vmatmul.mubr.bf16.gmra.mrb[28].mxu1 %v1934_v38  ;;  %1768 = vmatprep.mubr.bf16.mxu0 %v1937_v39 }
  0x62   : > { %1765 = vmatpush3.bf16.msra.mxu0 %v1935_v37  ;;  %1772 = vmatprep.mubr.bf16.mxu1 %v1938_v40 }
  0x63   : > { %1790 = vmatpush3.bf16.msra.mxu1 %v1935_v37  ;;  %1766 = vmatprep.subr.bf16.mxu0 %v1936_v41 }
  0x64   : > { %1783 = vmatprep.subr.bf16.mxu1 %v1936_v41 }
  0x66   : > { %1767 = vmatpush3.bf16.msra.mxu0 %v1936_v41 }
  0x67   : > { %1791 = vmatpush3.bf16.msra.mxu1 %v1936_v41 }
  0x69   : > { %1769 = vmatmul.mubr.bf16.vlgmr.msra.gmra.mrb[32].mxu0 %v1939_v42 }
  0x6a   : > { %1773 = vmatmul.mubr.bf16.vlgmr.msra.gmra.mrb[32].mxu1 %v1940_v43 }
  0xfb   : > { %v1596_v44 = vpop.f32.mrb[0].mxu0 }
  0xfc   : > { %v1636_v45 = vpop.f32.mrb[0].mxu1  ;;  %v1597_v46 = vpop.f32.mrb[1].mxu0 }
  0xfd   : > { %v1598_v47 = vadd.f32 %v1597_v46, %v1596_v44  ;;  %v1637_v48 = vpop.f32.mrb[1].mxu1  ;;  %v1599_v49 = vpop.f32.mrb[2].mxu0 }
  0xfe   : > { %v1638_v50 = vadd.f32 %v1637_v48, %v1636_v45  ;;  %v1639_v51 = vpop.f32.mrb[2].mxu1  ;;  %v1600_v52 = vpop.f32.mrb[3].mxu0 }
  0xff   : > { %v1601_v53 = vadd.f32 %v1600_v52, %v1599_v49  ;;  %v1640_v54 = vpop.f32.mrb[3].mxu1 }
 0x100   : > { %v1088_v55 = vadd.f32 %v1638_v50, %v1598_v47  ;;  %v1641_v56 = vadd.f32 %v1640_v54, %v1639_v51 }
 0x102   : > { %v1091_v57 = vadd.f32 %v1641_v56, %v1601_v53 }
 0x103   : > { %v1602_v58 = vpop.f32.mrb[4].mxu0 }
 0x104   : > { %v1642_v59 = vpop.f32.mrb[4].mxu1  ;;  %v1603_v60 = vpop.f32.mrb[5].mxu0 }
 0x105   : > { %v1604_v61 = vadd.f32 %v1603_v60, %v1602_v58  ;;  %v1643_v62 = vpop.f32.mrb[5].mxu1  ;;  %v1605_v63 = vpop.f32.mrb[6].mxu0 }
 0x106   : > { %v1644_v0 = vadd.f32 %v1643_v62, %v1642_v59  ;;  %v1645_v1 = vpop.f32.mrb[6].mxu1  ;;  %v1606_v2 = vpop.f32.mrb[7].mxu0 }
 0x107   : > { %v1607_v3 = vadd.f32 %v1606_v2, %v1605_v63  ;;  %v1646_v4 = vpop.f32.mrb[7].mxu1 }
 0x108   : > { %v1096_v5 = vadd.f32 %v1644_v0, %v1604_v61  ;;  %v1647_v6 = vadd.f32 %v1646_v4, %v1645_v1 }
 0x10a   : > { %v1099_v7 = vadd.f32 %v1647_v6, %v1607_v3 }
 0x10b   : > { %v1608_v8 = vpop.f32.mrb[8].mxu0 }
 0x10c   : > { %v1648_v9 = vpop.f32.mrb[8].mxu1  ;;  %v1609_v10 = vpop.f32.mrb[9].mxu0 }
 0x10d   : > { %v1610_v11 = vadd.f32 %v1609_v10, %v1608_v8  ;;  %v1649_v12 = vpop.f32.mrb[9].mxu1  ;;  %v1611_v13 = vpop.f32.mrb[10].mxu0 }
 0x10e   : > { %v1650_v14 = vadd.f32 %v1649_v12, %v1648_v9  ;;  %v1651_v15 = vpop.f32.mrb[10].mxu1  ;;  %v1612_v16 = vpop.f32.mrb[11].mxu0 }
 0x10f   : > { %v1613_v17 = vadd.f32 %v1612_v16, %v1611_v13  ;;  %v1652_v18 = vpop.f32.mrb[11].mxu1 }
 0x110   : > { %v1104_v19 = vadd.f32 %v1650_v14, %v1610_v11  ;;  %v1653_v20 = vadd.f32 %v1652_v18, %v1651_v15 }
 0x112   : > { %v1107_v21 = vadd.f32 %v1653_v20, %v1613_v17 }
 0x113   : > { %v1614_v22 = vpop.f32.mrb[12].mxu0 }
 0x114   : > { %v1654_v23 = vpop.f32.mrb[12].mxu1  ;;  %v1615_v24 = vpop.f32.mrb[13].mxu0 }
 0x115   : > { %v1655_v25 = vpop.f32.mrb[13].mxu1  ;;  %v1616_v26 = vadd.f32 %v1615_v24, %v1614_v22  ;;  %v1617_v28 = vpop.f32.mrb[14].mxu0 }
 0x116   : > { %v1656_v27 = vadd.f32 %v1655_v25, %v1654_v23  ;;  %v1657_v29 = vpop.f32.mrb[14].mxu1  ;;  %v1618_v30 = vpop.f32.mrb[15].mxu0 }
 0x117   : > { %v1658_v31 = vpop.f32.mrb[15].mxu1  ;;  %v1619_v33 = vadd.f32 %v1618_v30, %v1617_v28 }
 0x118   : > { %v1112_v32 = vadd.f32 %v1656_v27, %v1616_v26  ;;  %v1659_v34 = vadd.f32 %v1658_v31, %v1657_v29 }
 0x11a   : > { %v1115_v35 = vadd.f32 %v1659_v34, %v1619_v33 }
 0x11b   : > { %v1676_v36 = vpop.f32.mrb[16].mxu0 }
 0x11c   : > { %v1677_v37 = vpop.f32.mrb[17].mxu0  ;;  %v1716_v38 = vpop.f32.mrb[16].mxu1 }
 0x11d   : > { %v1678_v39 = vadd.f32 %v1677_v37, %v1676_v36  ;;  %v1679_v40 = vpop.f32.mrb[18].mxu0  ;;  %v1717_v41 = vpop.f32.mrb[17].mxu1 }
 0x11e   : > { %v1680_v42 = vpop.f32.mrb[19].mxu0  ;;  %v1718_v44 = vadd.f32 %v1717_v41, %v1716_v38  ;;  %v1719_v45 = vpop.f32.mrb[18].mxu1 }
 0x11f   : > { %v1153_v43 = vadd.f32 %v1678_v39, %v1088_v55  ;;  %v1681_v46 = vadd.f32 %v1680_v42, %v1679_v40  ;;  %v1720_v47 = vpop.f32.mrb[19].mxu1 }
 0x120   : > { %v1721_v49 = vadd.f32 %v1720_v47, %v1719_v45 }
 0x121   : > { %v1156_v48 = vadd.f32 %v1681_v46, %v1091_v57  ;;  %v1218_v50 = vadd.f32 %v1718_v44, %v1153_v43 }
 0x123   : > { %v1682_v51 = vpop.f32.mrb[20].mxu0  ;;  %v2261_v52 = vadd.f32 %v1721_v49, %v1156_v48 }
 0x124   : > { %v1683_v53 = vpop.f32.mrb[21].mxu0  ;;  %v1722_v54 = vpop.f32.mrb[20].mxu1 }
 0x125   : > { %v1684_v56 = vadd.f32 %v1683_v53, %v1682_v51  ;;  %v1685_v58 = vpop.f32.mrb[22].mxu0  ;;  %v1723_v59 = vpop.f32.mrb[21].mxu1 }
 0x126   : > { %v1686_v60 = vpop.f32.mrb[23].mxu0  ;;  %v1724_v62 = vadd.f32 %v1723_v59, %v1722_v54  ;;  %v1725_v63 = vpop.f32.mrb[22].mxu1 }
 0x127   : > { %v1161_v61 = vadd.f32 %v1684_v56, %v1096_v5  ;;  %v1687_v55 = vadd.f32 %v1686_v60, %v1685_v58  ;;  %v1726_v0 = vpop.f32.mrb[23].mxu1 }
 0x128   : > { %v1727_v2 = vadd.f32 %v1726_v0, %v1725_v63 }
 0x129   : > { %v1164_v1 = vadd.f32 %v1687_v55, %v1099_v7  ;;  %v1226_v3 = vadd.f32 %v1724_v62, %v1161_v61 }
 0x12b   : > { %v1688_v57 = vpop.f32.mrb[24].mxu0  ;;  %v1229_v4 = vadd.f32 %v1727_v2, %v1164_v1 }
 0x12c   : > { %v1689_v6 = vpop.f32.mrb[25].mxu0  ;;  %v1728_v8 = vpop.f32.mrb[24].mxu1 }
 0x12d   : > { %v1690_v9 = vadd.f32 %v1689_v6, %v1688_v57  ;;  %v1691_v10 = vpop.f32.mrb[26].mxu0  ;;  %v1729_v11 = vpop.f32.mrb[25].mxu1 }
 0x12e   : > { %v1692_v12 = vpop.f32.mrb[27].mxu0  ;;  %v1730_v14 = vadd.f32 %v1729_v11, %v1728_v8  ;;  %v1731_v15 = vpop.f32.mrb[26].mxu1 }
 0x12f   : > { %v1169_v13 = vadd.f32 %v1690_v9, %v1104_v19  ;;  %v1693_v16 = vadd.f32 %v1692_v12, %v1691_v10  ;;  %v1732_v5 = vpop.f32.mrb[27].mxu1 }
 0x130   : > { %v1733_v18 = vadd.f32 %v1732_v5, %v1731_v15 }
 0x131   : > { %v1172_v17 = vadd.f32 %v1693_v16, %v1107_v21  ;;  %v1234_v20 = vadd.f32 %v1730_v14, %v1169_v13 }
 0x133   : > { %v1694_v22 = vpop.f32.mrb[28].mxu0  ;;  %v1237_v7 = vadd.f32 %v1733_v18, %v1172_v17 }
 0x134   : > { %v1695_v23 = vpop.f32.mrb[29].mxu0  ;;  %v1734_v24 = vpop.f32.mrb[28].mxu1 }
 0x135   : > { %v1696_v25 = vadd.f32 %v1695_v23, %v1694_v22  ;;  %v1697_v26 = vpop.f32.mrb[30].mxu0  ;;  %v1735_v27 = vpop.f32.mrb[29].mxu1 }
 0x136   : > { %v1698_v28 = vpop.f32.mrb[31].mxu0  ;;  %v1736_v30 = vadd.f32 %v1735_v27, %v1734_v24  ;;  %v1737_v31 = vpop.f32.mrb[30].mxu1 }
 0x137   : > { %v1177_v29 = vadd.f32 %v1696_v25, %v1112_v32  ;;  %v1699_v19 = vadd.f32 %v1698_v28, %v1697_v26  ;;  %v1738_v33 = vpop.f32.mrb[31].mxu1 }
 0x138   : > { %v1739_v36 = vadd.f32 %v1738_v33, %v1737_v31 }
 0x139   : > { %v1180_v34 = vadd.f32 %v1699_v19, %v1115_v35  ;;  %v1242_v37 = vadd.f32 %v1736_v30, %v1177_v29 }
 0x13b   : > { %v1245_v21 = vadd.f32 %v1739_v36, %v1180_v34 }
 0x13c   : > { %v1770_v38 = vpop.f32.mrb[32].mxu0 }
 0x13d   : > { %v1291_v39 = vadd.f32 %v1770_v38, %v1226_v3  ;;  %v1774_v40 = vpop.f32.mrb[32].mxu1  ;;  %v1282_v41 = vpop.f32.mrb[33].mxu0 }
 0x13e   : > { %v1307_v42 = vadd.f32 %v1774_v40, %v1242_v37  ;;  %v1283_v32 = vadd.f32 %v1282_v41, %v1218_v50  ;;  %v1298_v43 = vpop.f32.mrb[33].mxu1  ;;  %v1771_v44 = vpop.f32.mrb[34].mxu0 }
 0x13f   : > { %v1574_v45 = vpack.c.bf16 %v1291_v39, %v1291_v39  ;;  %v1299_v46 = vadd.f32 %v1298_v43, %v1234_v20  ;;  %v1294_v35 = vadd.f32 %v1771_v44, %v1229_v4  ;;  %v1775_v47 = vpop.f32.mrb[34].mxu1  ;;  %v1285_v48 = vpop.f32.mrb[35].mxu0 }
 0x140   : > { %v1578_v49 = vpack.c.bf16 %v1307_v42, %v1307_v42  ;;  %v1572_v51 = vpack.c.bf16 %v1283_v32, %v1283_v32  ;;  %v1310_v53 = vadd.f32 %v1775_v47, %v1245_v21  ;;  %v1286_v54 = vadd.f32 %v1285_v48, %v2261_v52  ;;  %v1301_v56 = vpop.f32.mrb[35].mxu1 }
 0x141   : > { %1348 = vst.msk [vmem:[%s185_s23 + $0x8] sm:$0xf] %vm1345_vm0, %v1574_v45  ;;  %v1576_v58 = vpack.c.bf16 %v1299_v46, %v1299_v46  ;;  %v1575_v59 = vpack.c.bf16 %v1294_v35, %v1294_v35  ;;  %v1302_v60 = vadd.f32 %v1301_v56, %v1237_v7 }
 0x142   : > { %1352 = vst.msk [vmem:[%s185_s23 + $0x18] sm:$0xf] %vm1345_vm0, %v1578_v49  ;;  %1346 = vst.msk [vmem:[%s185_s23] sm:$0xf] %vm1345_vm0, %v1572_v51  ;;  %v1579_v50 = vpack.c.bf16 %v1310_v53, %v1310_v53  ;;  %v1573_v61 = vpack.c.bf16 %v1286_v54, %v1286_v54 }
 0x143   : > { %1350 = vst.msk [vmem:[%s185_s23 + $0x10] sm:$0xf] %vm1345_vm0, %v1576_v58  ;;  %1349 = vst.msk [vmem:[%s185_s23 + $0xc] sm:$0xf] %vm1345_vm0, %v1575_v59  ;;  %v1577_v62 = vpack.c.bf16 %v1302_v60, %v1302_v60 }
 0x144   : > { %1353 = vst.msk [vmem:[%s185_s23 + $0x1c] sm:$0xf] %vm1345_vm0, %v1579_v50  ;;  %1347 = vst.msk [vmem:[%s185_s23 + $0x4] sm:$0xf] %vm1345_vm0, %v1573_v61 }
 0x145   : > { %1351 = vst.msk [vmem:[%s185_s23 + $0x14] sm:$0xf] %vm1345_vm0, %v1577_v62 }
 0x146 PF: > { %s12_s11 = sadd.s32 1, %s1963_s11   ;;  %s2288_s9 = smov %s1959_s10 }
 0x147   : > { %p9_p5 = scmp.ge.s32.totalorder %s12_s11, 4   ;;  %s2289_s10 = smov %s2291_s12 }
 0x149   :  { %11 = sbr.rel (!%p9_p5) target bundleno = 2 (0x2), region = 61 }

// kernel: densenet121_forward.21
= control target key start
LH: loop header
LB: loop body
LE: loop exit
PB: predicated region body
PF: predicated region fallthrough
CT: control target
= control target key end

     0   :  { %s1041_s21 = smov 0   ;;  %s1043_s22 = smov 0   ;;  %s1192_s0 = inlined_call_operand.vmem [shape: bf16[128,256], index: 0, kind: input, shape index: {}]   ;;  %s1193_s1 = inlined_call_operand.vmem [shape: bf16[256,128], index: 1, kind: input, shape index: {}]   ;;  %s1194_s2 = inlined_call_operand.vmem [shape: f32[1,256], index: 2, kind: input, shape index: {}]   ;;  %s1195_s3 = inlined_call_operand.vmem [shape: f32[1,256], index: 3, kind: input, shape index: {}]   ;;  %s1196_s4 = inlined_call_operand.vmem [shape: f32[1,128], index: 4, kind: input, shape index: {}]   ;;  %s1197_s5 = inlined_call_operand.vmem [shape: f32[1,128], index: 5, kind: input, shape index: {}]   ;;  %s1198_s6 = inlined_call_operand.vmem [shape: bf16[128,128], index: 6, kind: output, shape index: {}]  }
   0x1   :  { %s1045_s23 = smov 0  }
   0x2 LB: > { %s28_s24 = sadd.s32 1, %s1000_s22  ;;  %p820_p0 = scmp.ge.s32.totalorder %s1004_s23, 1  ;;  %s1004_s23 = sphi %s1045_s23, %s16_s23   ;;  %s1000_s22 = sphi %s1043_s22, %s1200_s22   ;;  %s996_s21 = sphi %s1041_s21, %s1199_s21  }
   0x3   : > { %p30_p1 = scmp.ge.s32.totalorder %s28_s24, 2  ;;  %p253_p2 = scmp.lt.s32.totalorder %s1004_s23, 3 }
   0x5   : > { %s1202_s24 = smov (%p30_p1, %s28_s24), 0  ;;  %p254_p3 = pnand %p820_p0, %p253_p2 }
   0x6   : > { %v966_v0 = vld [vmem:[%s1193_s1 + $0x40] sm:$0xff] (!%p254_p3)   ;;  %s821_s27 = sshll.u32 (!%p254_p3), %s996_s21, 3  ;;  %v968_v2 = vld [vmem:[%s1193_s1 + $0x48] sm:$0xff] (!%p254_p3)   ;;  %v970_v4 = vld [vmem:[%s1193_s1 + $0x50] sm:$0xff] (!%p254_p3)   ;;  %v350_v5 = vlaneseq (!%p254_p3) }
   0x7   : > { %257 = sbr.rel (%p254_p3) target bundleno = 274 (0x112), region = 44  ;;  %v967_v1 = vld [vmem:[%s1193_s1] sm:$0xff] (!%p254_p3)   ;;  %886 = vmatprep.subr.bf16.mxu0 (!%p254_p3), %v966_v0  ;;  %926 = vmatprep.subr.bf16.mxu1 (!%p254_p3), %v966_v0  ;;  %p298_p4 = scmp.lt.s32.totalorder (!%p254_p3), %s821_s27, 15  ;;  %v969_v3 = vld [vmem:[%s1193_s1 + $0x8] sm:$0xff] (!%p254_p3)   ;;  %v971_v6 = vld [vmem:[%s1193_s1 + $0x10] sm:$0xff] (!%p254_p3)  }
   0x8   : > { %887 = vmatpush3.bf16.msra.mxu0 (!%p254_p3), %v967_v1  ;;  %934 = vmatpush3.bf16.msra.mxu1 (!%p254_p3), %v967_v1  ;;  %v972_v7 = vld [vmem:[%s1193_s1 + $0x58] sm:$0xff] (!%p254_p3)   ;;  %v351_v8 = vshrl.u32 (!%p254_p3), %v350_v5, 7  ;;  %v974_v10 = vld [vmem:[%s1193_s1 + $0x60] sm:$0xff] (!%p254_p3)   ;;  %v976_v14 = vld [vmem:[%s1193_s1 + $0x68] sm:$0xff] (!%p254_p3)  }
   0x9   : > { %888 = vmatprep.subr.bf16.mxu0 (!%p254_p3), %v968_v2  ;;  %927 = vmatprep.subr.bf16.mxu1 (!%p254_p3), %v968_v2  ;;  %v973_v9 = vld [vmem:[%s1193_s1 + $0x18] sm:$0xff] (!%p254_p3)   ;;  %v975_v12 = vld [vmem:[%s1193_s1 + $0x20] sm:$0xff] (!%p254_p3)   ;;  %v977_v30 = vld [vmem:[%s1193_s1 + $0x28] sm:$0xff] (!%p254_p3)  }
   0xa   : > { %v352_v11 = vsub.s32 (!%p254_p3), 0, %v351_v8  ;;  %v356_v13 = vsub.s32 (!%p254_p3), 1, %v351_v8  ;;  %v348_v17 = vld [vmem:[%s1194_s2] sm:$0x3] (!%p254_p3)  ;;  %v978_v35 = vld [vmem:[%s1193_s1 + $0x70] sm:$0xff] (!%p254_p3)   ;;  %v980_v54 = vld [vmem:[%s1193_s1 + $0x78] sm:$0xff] (!%p254_p3)  }
   0xb   : > { %v376_v22 = vld [vmem:[%s1195_s3] sm:$0x3] (!%p254_p3)  ;;  %v979_v49 = vld [vmem:[%s1193_s1 + $0x30] sm:$0xff] (!%p254_p3)   ;;  %v981_v5 = vld [vmem:[%s1193_s1 + $0x38] sm:$0xff] (!%p254_p3)  }
   0xc   : > { %889 = vmatpush3.bf16.msra.mxu0 (!%p254_p3), %v969_v3  ;;  %935 = vmatpush3.bf16.msra.mxu1 (!%p254_p3), %v969_v3  ;;  %v1110_v25 = vrot.slane (!%p254_p3), %v348_v17, %v352_v11  ;;  %v1112_v26 = vrot.slane (!%p254_p3), %v348_v17, %v356_v13  ;;  %v1114_v27 = vrot.slane (!%p254_p3), %v376_v22, %v352_v11 }
   0xd   : > { %890 = vmatprep.subr.bf16.mxu0 (!%p254_p3), %v970_v4  ;;  %928 = vmatprep.subr.bf16.mxu1 (!%p254_p3), %v970_v4  ;;  %v1116_v28 = vrot.slane (!%p254_p3), %v376_v22, %v356_v13 }
   0xe   : > { %s1204_s27 = smov (!%p298_p4, %s821_s27), 15 }
   0xf   : > { %s854_s16 = sshll.u32 %s1204_s27, 3  ;;  %s825_s30 = sshll.u32 %s1204_s27, 2 }
  0x10   : > { %891 = vmatpush3.bf16.msra.mxu0 %v971_v6  ;;  %936 = vmatpush3.bf16.msra.mxu1 %v971_v6  ;;  %s1092_s26 = scalar_lea.vmem %s1192_s0, %s854_s16  ;;  %s321_s9 = scalar_lea.vmem %s1198_s6, %s825_s30 }
  0x11   : > { %892 = vmatprep.subr.bf16.mxu0 %v972_v7  ;;  %929 = vmatprep.subr.bf16.mxu1 %v972_v7  ;;  %v324_v15 = vld [vmem:[%s1092_s26] sm:$0xff]  ;;  %v325_v16 = vld [vmem:[%s1092_s26 + $0x8] sm:$0xff]  ;;  %v1119_v29 = vld [vmem:[%s1092_s26 + $0x10] sm:$0xff] }
  0x12   : > { %v332_v18 = vunpack.c.l.bf16 %v324_v15  ;;  %v333_v19 = vunpack.c.h.bf16 %v324_v15  ;;  %v334_v20 = vunpack.c.l.bf16 %v325_v16  ;;  %v335_v21 = vunpack.c.h.bf16 %v325_v16  ;;  %v328_v23 = vld [vmem:[%s1092_s26 + $0x20] sm:$0xff]  ;;  %v329_v24 = vld [vmem:[%s1092_s26 + $0x28] sm:$0xff]  ;;  %v327_v39 = vld [vmem:[%s1092_s26 + $0x18] sm:$0xff] }
  0x13   : > { %v340_v31 = vunpack.c.l.bf16 %v328_v23  ;;  %v341_v32 = vunpack.c.h.bf16 %v328_v23  ;;  %v342_v33 = vunpack.c.l.bf16 %v329_v24  ;;  %v343_v34 = vunpack.c.h.bf16 %v329_v24  ;;  %v330_v59 = vld [vmem:[%s1092_s26 + $0x30] sm:$0xff]  ;;  %v331_v0 = vld [vmem:[%s1092_s26 + $0x38] sm:$0xff] }
  0x14   : > { %893 = vmatpush3.bf16.msra.mxu0 %v973_v9  ;;  %937 = vmatpush3.bf16.msra.mxu1 %v973_v9  ;;  %v361_v36 = vmul.f32 %v1112_v26, %v333_v19  ;;  %v363_v37 = vmul.f32 %v1112_v26, %v335_v21  ;;  %v360_v38 = vmul.f32 %v1110_v25, %v332_v18  ;;  %v337_v40 = vunpack.c.h.bf16 %v1119_v29 }
  0x15   : > { %894 = vmatprep.subr.bf16.mxu0 %v974_v10  ;;  %930 = vmatprep.subr.bf16.mxu1 %v974_v10  ;;  %v369_v41 = vmul.f32 %v1112_v26, %v341_v32  ;;  %v371_v42 = vmul.f32 %v1112_v26, %v343_v34  ;;  %v362_v43 = vmul.f32 %v1110_v25, %v334_v20  ;;  %v339_v53 = vunpack.c.h.bf16 %v327_v39 }
  0x16   : > { %v368_v44 = vmul.f32 %v1110_v25, %v340_v31  ;;  %v389_v45 = vadd.f32 %v1116_v28, %v361_v36  ;;  %v391_v46 = vadd.f32 %v1116_v28, %v363_v37  ;;  %v388_v47 = vadd.f32 %v1114_v27, %v360_v38 }
  0x17   : > { %v370_v48 = vmul.f32 %v1110_v25, %v342_v33  ;;  %v397_v50 = vadd.f32 %v1116_v28, %v369_v41  ;;  %v399_v51 = vadd.f32 %v1116_v28, %v371_v42  ;;  %v390_v52 = vadd.f32 %v1114_v27, %v362_v43 }
  0x18   : > { %895 = vmatpush3.bf16.msra.mxu0 %v975_v12  ;;  %938 = vmatpush3.bf16.msra.mxu1 %v975_v12  ;;  %v405_v55 = vmax.f32 %v389_v45, 0.0  ;;  %v407_v56 = vmax.f32 %v391_v46, 0.0  ;;  %v404_v57 = vmax.f32 %v388_v47, 0.0  ;;  %v396_v58 = vadd.f32 %v1114_v27, %v368_v44  ;;  %v842_v46 = vld [vmem:[%s1196_s4] ss:$0 sm:$0xff] }
  0x19   : > { %896 = vmatprep.subr.bf16.mxu0 %v976_v14  ;;  %931 = vmatprep.subr.bf16.mxu1 %v976_v14  ;;  %v413_v60 = vmax.f32 %v397_v50, 0.0  ;;  %v415_v61 = vmax.f32 %v399_v51, 0.0  ;;  %v406_v62 = vmax.f32 %v390_v52, 0.0  ;;  %v398_v63 = vadd.f32 %v1114_v27, %v370_v48  ;;  %v843_v51 = vld [vmem:[%s1197_s5] ss:$0 sm:$0xff] }
  0x1a   : > { %v421_v1 = vpack.c.bf16 %v407_v56, %v405_v55  ;;  %v412_v2 = vmax.f32 %v396_v58, 0.0  ;;  %v365_v3 = vmul.f32 %v1112_v26, %v337_v40  ;;  %v367_v4 = vmul.f32 %v1112_v26, %v339_v53 }
  0x1b   : > { %v425_v6 = vpack.c.bf16 %v415_v61, %v413_v60  ;;  %v420_v7 = vpack.c.bf16 %v406_v62, %v404_v57  ;;  %v414_v8 = vmax.f32 %v398_v63, 0.0  ;;  %v345_v9 = vunpack.c.h.bf16 %v330_v59 }
  0x1c   : > { %897 = vmatpush3.bf16.msra.mxu0 %v977_v30  ;;  %939 = vmatpush3.bf16.msra.mxu1 %v977_v30  ;;  %v393_v10 = vadd.f32 %v1116_v28, %v365_v3  ;;  %v395_v11 = vadd.f32 %v1116_v28, %v367_v4  ;;  %v347_v12 = vunpack.c.h.bf16 %v331_v0  ;;  %v336_v13 = vunpack.c.l.bf16 %v1119_v29 }
  0x1d   : > { %898 = vmatprep.subr.bf16.mxu0 %v978_v35  ;;  %932 = vmatprep.subr.bf16.mxu1 %v978_v35  ;;  %v424_v14 = vpack.c.bf16 %v414_v8, %v412_v2  ;;  %v373_v15 = vmul.f32 %v1112_v26, %v345_v9  ;;  %v338_v16 = vunpack.c.l.bf16 %v327_v39  ;;  %v344_v17 = vunpack.c.l.bf16 %v330_v59 }
  0x1e   : > { %588 = vmatprep.mubr.bf16.mxu0 %v421_v1  ;;  %604 = vmatprep.mubr.bf16.mxu1 %v425_v6  ;;  %v409_v18 = vmax.f32 %v393_v10, 0.0  ;;  %v411_v19 = vmax.f32 %v395_v11, 0.0  ;;  %v375_v20 = vmul.f32 %v1112_v26, %v347_v12  ;;  %v364_v21 = vmul.f32 %v1110_v25, %v336_v13 }
  0x1f   : > { %v401_v22 = vadd.f32 %v1116_v28, %v373_v15  ;;  %v366_v23 = vmul.f32 %v1110_v25, %v338_v16  ;;  %v346_v24 = vunpack.c.l.bf16 %v331_v0  ;;  %v372_v29 = vmul.f32 %v1110_v25, %v344_v17 }
  0x20   : > { %899 = vmatpush3.bf16.msra.mxu0 %v979_v49  ;;  %940 = vmatpush3.bf16.msra.mxu1 %v979_v49  ;;  %v423_v30 = vpack.c.bf16 %v411_v19, %v409_v18  ;;  %v403_v31 = vadd.f32 %v1116_v28, %v375_v20  ;;  %v392_v32 = vadd.f32 %v1114_v27, %v364_v21 }
  0x21   : > { %900 = vmatprep.subr.bf16.mxu0 %v980_v54  ;;  %933 = vmatprep.subr.bf16.mxu1 %v980_v54  ;;  %v417_v33 = vmax.f32 %v401_v22, 0.0  ;;  %v394_v34 = vadd.f32 %v1114_v27, %v366_v23  ;;  %v374_v26 = vmul.f32 %v1110_v25, %v346_v24  ;;  %v400_v35 = vadd.f32 %v1114_v27, %v372_v29 }
  0x22   : > { %v419_v36 = vmax.f32 %v403_v31, 0.0  ;;  %v408_v37 = vmax.f32 %v392_v32, 0.0 }
  0x23   : > { %v410_v38 = vmax.f32 %v394_v34, 0.0  ;;  %v402_v39 = vadd.f32 %v1114_v27, %v374_v26  ;;  %v416_v40 = vmax.f32 %v400_v35, 0.0 }
  0x24   : > { %901 = vmatpush3.bf16.msra.mxu0 %v981_v5  ;;  %941 = vmatpush3.bf16.msra.mxu1 %v981_v5  ;;  %v427_v41 = vpack.c.bf16 %v419_v36, %v417_v33 }
  0x25   : > { %v418_v28 = vmax.f32 %v402_v39, 0.0  ;;  %v422_v42 = vpack.c.bf16 %v410_v38, %v408_v37 }
  0x27   : > { %589 = vmatmul.mubr.bf16.vlgmr.msra.gmra.mrb[0].mxu0 %v420_v7  ;;  %605 = vmatmul.mubr.bf16.vlgmr.msra.gmra.mrb[0].mxu1 %v424_v14  ;;  %v426_v43 = vpack.c.bf16 %v418_v28, %v416_v40 }
  0x28   : > { %596 = vmatprep.mubr.bf16.mxu0 %v423_v30  ;;  %612 = vmatprep.mubr.bf16.mxu1 %v427_v41 }
  0x2f   : > { %597 = vmatmul.mubr.bf16.gmra.mrb[4].mxu0 %v422_v42  ;;  %613 = vmatmul.mubr.bf16.gmra.mrb[4].mxu1 %v426_v43 }
  0xfa   : > { %v902_v44 = vpop.f32.mrb[0].mxu0  ;;  %v914_v25 = vpop.f32.mrb[0].mxu1 }
  0xfb   : > { %v903_v45 = vpop.f32.mrb[1].mxu0  ;;  %v915_v47 = vpop.f32.mrb[1].mxu1 }
  0xfc   : > { %v904_v48 = vadd.f32 %v903_v45, %v902_v44  ;;  %v916_v49 = vadd.f32 %v915_v47, %v914_v25  ;;  %v905_v27 = vpop.f32.mrb[2].mxu0  ;;  %v917_v50 = vpop.f32.mrb[2].mxu1 }
  0xfd   : > { %v906_v52 = vpop.f32.mrb[3].mxu0  ;;  %v918_v53 = vpop.f32.mrb[3].mxu1 }
  0xfe   : > { %v628_v54 = vmul.f32 %v904_v48, %v842_v46  ;;  %v632_v55 = vmul.f32 %v916_v49, %v842_v46  ;;  %v907_v56 = vadd.f32 %v906_v52, %v905_v27  ;;  %v919_v57 = vadd.f32 %v918_v53, %v917_v50 }
 0x100   : > { %v643_v58 = vadd.f32 %v843_v51, %v628_v54  ;;  %v647_v59 = vadd.f32 %v843_v51, %v632_v55  ;;  %v629_v60 = vmul.f32 %v907_v56, %v842_v46  ;;  %v633_v61 = vmul.f32 %v919_v57, %v842_v46 }
 0x102   : > { %v644_v62 = vadd.f32 %v843_v51, %v629_v60  ;;  %v648_v63 = vadd.f32 %v843_v51, %v633_v61  ;;  %v908_v0 = vpop.f32.mrb[4].mxu0  ;;  %v920_v1 = vpop.f32.mrb[4].mxu1  ;;  %v651_v2 = vmax.f32 %v643_v58, 0.0  ;;  %v655_v3 = vmax.f32 %v647_v59, 0.0 }
 0x103   : > { %v909_v4 = vpop.f32.mrb[5].mxu0  ;;  %v921_v5 = vpop.f32.mrb[5].mxu1 }
 0x104   : > { %v652_v6 = vmax.f32 %v644_v62, 0.0  ;;  %v656_v7 = vmax.f32 %v648_v63, 0.0  ;;  %v910_v8 = vadd.f32 %v909_v4, %v908_v0  ;;  %v922_v9 = vadd.f32 %v921_v5, %v920_v1  ;;  %v911_v10 = vpop.f32.mrb[6].mxu0  ;;  %v923_v11 = vpop.f32.mrb[6].mxu1 }
 0x105   : > { %v912_v12 = vpop.f32.mrb[7].mxu0  ;;  %v924_v13 = vpop.f32.mrb[7].mxu1 }
 0x106   : > { %v866_v14 = vpack.c.bf16 %v652_v6, %v651_v2  ;;  %v876_v15 = vpack.c.bf16 %v656_v7, %v655_v3  ;;  %v630_v16 = vmul.f32 %v910_v8, %v842_v46  ;;  %v634_v17 = vmul.f32 %v922_v9, %v842_v46 }
 0x107   : > { %v913_v18 = vadd.f32 %v912_v12, %v911_v10  ;;  %v925_v19 = vadd.f32 %v924_v13, %v923_v11 }
 0x108   : > { %867 = vst [vmem:[%s321_s9] sm:$0xff] %v866_v14   ;;  %884 = vst [vmem:[%s321_s9 + $0x10] sm:$0xff] %v876_v15   ;;  %v645_v20 = vadd.f32 %v843_v51, %v630_v16  ;;  %v649_v21 = vadd.f32 %v843_v51, %v634_v17 }
 0x109   : > { %v631_v22 = vmul.f32 %v913_v18, %v842_v46  ;;  %v635_v23 = vmul.f32 %v925_v19, %v842_v46 }
 0x10a   : > { %v653_v30 = vmax.f32 %v645_v20, 0.0  ;;  %v657_v31 = vmax.f32 %v649_v21, 0.0 }
 0x10b   : > { %v646_v24 = vadd.f32 %v843_v51, %v631_v22  ;;  %v650_v29 = vadd.f32 %v843_v51, %v635_v23 }
 0x10d   : > { %v654_v32 = vmax.f32 %v646_v24, 0.0  ;;  %v658_v33 = vmax.f32 %v650_v29, 0.0 }
 0x10f   : > { %v871_v34 = vpack.c.bf16 %v654_v32, %v653_v30  ;;  %v881_v26 = vpack.c.bf16 %v658_v33, %v657_v31 }
 0x111   : > { %883 = vst [vmem:[%s321_s9 + $0x8] sm:$0xff] %v871_v34   ;;  %885 = vst [vmem:[%s321_s9 + $0x18] sm:$0xff] %v881_v26  }
 0x112 PF: > { %s16_s23 = sadd.s32 1, %s1004_s23   ;;  %s1199_s21 = smov %s1000_s22 }
 0x113   : > { %p13_p5 = scmp.ge.s32.totalorder %s16_s23, 4   ;;  %s1200_s22 = smov %s1202_s24 }
 0x115   :  { %15 = sbr.rel (!%p13_p5) target bundleno = 2 (0x2), region = 83 }

// kernel: densenet121_forward.27
= control target key start
LH: loop header
LB: loop body
LE: loop exit
PB: predicated region body
PF: predicated region fallthrough
CT: control target
= control target key end

     0   :  { %s883_s15 = smov 0   ;;  %s885_s16 = smov 0   ;;  %s1028_s0 = inlined_call_operand.vmem [shape: bf16[128,256], index: 0, kind: input, shape index: {}]   ;;  %s1029_s1 = inlined_call_operand.vmem [shape: bf16[256,128], index: 1, kind: input, shape index: {}]   ;;  %s1030_s2 = inlined_call_operand.vmem [shape: f32[1,256], index: 2, kind: input, shape index: {}]   ;;  %s1031_s3 = inlined_call_operand.vmem [shape: f32[1,256], index: 3, kind: input, shape index: {}]   ;;  %s1032_s4 = inlined_call_operand.vmem [shape: bf16[128,128], index: 4, kind: output, shape index: {}]  }
   0x1   :  { %s887_s17 = smov 0  }
   0x2 LB: > { %s26_s18 = sadd.s32 1, %s852_s16  ;;  %p674_p0 = scmp.ge.s32.totalorder %s856_s17, 1  ;;  %s856_s17 = sphi %s887_s17, %s14_s17   ;;  %s852_s16 = sphi %s885_s16, %s1034_s16   ;;  %s848_s15 = sphi %s883_s15, %s1033_s15  }
   0x3   : > { %p28_p1 = scmp.ge.s32.totalorder %s26_s18, 2  ;;  %p187_p2 = scmp.lt.s32.totalorder %s856_s17, 3 }
   0x5   : > { %s1036_s18 = smov (%p28_p1, %s26_s18), 0  ;;  %p188_p3 = pnand %p674_p0, %p187_p2 }
   0x6   : > { %v818_v0 = vld [vmem:[%s1029_s1 + $0x40] sm:$0xff] (!%p188_p3)   ;;  %s675_s21 = sshll.u32 (!%p188_p3), %s848_s15, 3  ;;  %v820_v2 = vld [vmem:[%s1029_s1 + $0x48] sm:$0xff] (!%p188_p3)   ;;  %v822_v4 = vld [vmem:[%s1029_s1 + $0x50] sm:$0xff] (!%p188_p3)   ;;  %v268_v5 = vlaneseq (!%p188_p3) }
   0x7   : > { %191 = sbr.rel (%p188_p3) target bundleno = 267 (0x10b), region = 36  ;;  %v819_v1 = vld [vmem:[%s1029_s1] sm:$0xff] (!%p188_p3)   ;;  %738 = vmatprep.subr.bf16.mxu0 (!%p188_p3), %v818_v0  ;;  %778 = vmatprep.subr.bf16.mxu1 (!%p188_p3), %v818_v0  ;;  %p222_p4 = scmp.lt.s32.totalorder (!%p188_p3), %s675_s21, 15  ;;  %v821_v3 = vld [vmem:[%s1029_s1 + $0x8] sm:$0xff] (!%p188_p3)   ;;  %v823_v6 = vld [vmem:[%s1029_s1 + $0x10] sm:$0xff] (!%p188_p3)  }
   0x8   : > { %739 = vmatpush3.bf16.msra.mxu0 (!%p188_p3), %v819_v1  ;;  %786 = vmatpush3.bf16.msra.mxu1 (!%p188_p3), %v819_v1  ;;  %v824_v7 = vld [vmem:[%s1029_s1 + $0x58] sm:$0xff] (!%p188_p3)   ;;  %v269_v8 = vshrl.u32 (!%p188_p3), %v268_v5, 7  ;;  %v826_v10 = vld [vmem:[%s1029_s1 + $0x60] sm:$0xff] (!%p188_p3)   ;;  %v828_v14 = vld [vmem:[%s1029_s1 + $0x68] sm:$0xff] (!%p188_p3)  }
   0x9   : > { %740 = vmatprep.subr.bf16.mxu0 (!%p188_p3), %v820_v2  ;;  %779 = vmatprep.subr.bf16.mxu1 (!%p188_p3), %v820_v2  ;;  %v825_v9 = vld [vmem:[%s1029_s1 + $0x18] sm:$0xff] (!%p188_p3)   ;;  %v827_v12 = vld [vmem:[%s1029_s1 + $0x20] sm:$0xff] (!%p188_p3)   ;;  %v829_v30 = vld [vmem:[%s1029_s1 + $0x28] sm:$0xff] (!%p188_p3)  }
   0xa   : > { %v270_v11 = vsub.s32 (!%p188_p3), 0, %v269_v8  ;;  %v274_v13 = vsub.s32 (!%p188_p3), 1, %v269_v8  ;;  %v266_v17 = vld [vmem:[%s1030_s2] sm:$0x3] (!%p188_p3)  ;;  %v830_v35 = vld [vmem:[%s1029_s1 + $0x70] sm:$0xff] (!%p188_p3)   ;;  %v832_v54 = vld [vmem:[%s1029_s1 + $0x78] sm:$0xff] (!%p188_p3)  }
   0xb   : > { %v294_v22 = vld [vmem:[%s1031_s3] sm:$0x3] (!%p188_p3)  ;;  %v831_v49 = vld [vmem:[%s1029_s1 + $0x30] sm:$0xff] (!%p188_p3)   ;;  %v833_v5 = vld [vmem:[%s1029_s1 + $0x38] sm:$0xff] (!%p188_p3)  }
   0xc   : > { %741 = vmatpush3.bf16.msra.mxu0 (!%p188_p3), %v821_v3  ;;  %787 = vmatpush3.bf16.msra.mxu1 (!%p188_p3), %v821_v3  ;;  %v952_v25 = vrot.slane (!%p188_p3), %v266_v17, %v270_v11  ;;  %v954_v26 = vrot.slane (!%p188_p3), %v266_v17, %v274_v13  ;;  %v956_v27 = vrot.slane (!%p188_p3), %v294_v22, %v270_v11 }
   0xd   : > { %742 = vmatprep.subr.bf16.mxu0 (!%p188_p3), %v822_v4  ;;  %780 = vmatprep.subr.bf16.mxu1 (!%p188_p3), %v822_v4  ;;  %v958_v28 = vrot.slane (!%p188_p3), %v294_v22, %v274_v13 }
   0xe   : > { %s1038_s21 = smov (!%p222_p4, %s675_s21), 15 }
   0xf   : > { %s706_s8 = sshll.u32 %s1038_s21, 3  ;;  %s679_s12 = sshll.u32 %s1038_s21, 2 }
  0x10   : > { %743 = vmatpush3.bf16.msra.mxu0 %v823_v6  ;;  %788 = vmatpush3.bf16.msra.mxu1 %v823_v6  ;;  %s934_s15 = scalar_lea.vmem %s1028_s0, %s706_s8 }
  0x11   : > { %744 = vmatprep.subr.bf16.mxu0 %v824_v7  ;;  %781 = vmatprep.subr.bf16.mxu1 %v824_v7  ;;  %v242_v15 = vld [vmem:[%s934_s15] sm:$0xff]  ;;  %v243_v16 = vld [vmem:[%s934_s15 + $0x8] sm:$0xff]  ;;  %v961_v29 = vld [vmem:[%s934_s15 + $0x10] sm:$0xff] }
  0x12   : > { %v250_v18 = vunpack.c.l.bf16 %v242_v15  ;;  %v251_v19 = vunpack.c.h.bf16 %v242_v15  ;;  %v252_v20 = vunpack.c.l.bf16 %v243_v16  ;;  %v253_v21 = vunpack.c.h.bf16 %v243_v16  ;;  %v246_v23 = vld [vmem:[%s934_s15 + $0x20] sm:$0xff]  ;;  %v247_v24 = vld [vmem:[%s934_s15 + $0x28] sm:$0xff]  ;;  %v245_v39 = vld [vmem:[%s934_s15 + $0x18] sm:$0xff] }
  0x13   : > { %v258_v31 = vunpack.c.l.bf16 %v246_v23  ;;  %v259_v32 = vunpack.c.h.bf16 %v246_v23  ;;  %v260_v33 = vunpack.c.l.bf16 %v247_v24  ;;  %v261_v34 = vunpack.c.h.bf16 %v247_v24  ;;  %v248_v59 = vld [vmem:[%s934_s15 + $0x30] sm:$0xff]  ;;  %v249_v0 = vld [vmem:[%s934_s15 + $0x38] sm:$0xff]  ;;  %s239_s15 = scalar_lea.vmem %s1032_s4, %s679_s12 }
  0x14   : > { %745 = vmatpush3.bf16.msra.mxu0 %v825_v9  ;;  %789 = vmatpush3.bf16.msra.mxu1 %v825_v9  ;;  %v279_v36 = vmul.f32 %v954_v26, %v251_v19  ;;  %v281_v37 = vmul.f32 %v954_v26, %v253_v21  ;;  %v278_v38 = vmul.f32 %v952_v25, %v250_v18  ;;  %v255_v40 = vunpack.c.h.bf16 %v961_v29 }
  0x15   : > { %746 = vmatprep.subr.bf16.mxu0 %v826_v10  ;;  %782 = vmatprep.subr.bf16.mxu1 %v826_v10  ;;  %v287_v41 = vmul.f32 %v954_v26, %v259_v32  ;;  %v289_v42 = vmul.f32 %v954_v26, %v261_v34  ;;  %v280_v43 = vmul.f32 %v952_v25, %v252_v20  ;;  %v257_v53 = vunpack.c.h.bf16 %v245_v39 }
  0x16   : > { %v286_v44 = vmul.f32 %v952_v25, %v258_v31  ;;  %v307_v45 = vadd.f32 %v958_v28, %v279_v36  ;;  %v309_v46 = vadd.f32 %v958_v28, %v281_v37  ;;  %v306_v47 = vadd.f32 %v956_v27, %v278_v38 }
  0x17   : > { %v288_v48 = vmul.f32 %v952_v25, %v260_v33  ;;  %v315_v50 = vadd.f32 %v958_v28, %v287_v41  ;;  %v317_v51 = vadd.f32 %v958_v28, %v289_v42  ;;  %v308_v52 = vadd.f32 %v956_v27, %v280_v43 }
  0x18   : > { %747 = vmatpush3.bf16.msra.mxu0 %v827_v12  ;;  %790 = vmatpush3.bf16.msra.mxu1 %v827_v12  ;;  %v323_v55 = vmax.f32 %v307_v45, 0.0  ;;  %v325_v56 = vmax.f32 %v309_v46, 0.0  ;;  %v322_v57 = vmax.f32 %v306_v47, 0.0  ;;  %v314_v58 = vadd.f32 %v956_v27, %v286_v44 }
  0x19   : > { %748 = vmatprep.subr.bf16.mxu0 %v828_v14  ;;  %783 = vmatprep.subr.bf16.mxu1 %v828_v14  ;;  %v331_v60 = vmax.f32 %v315_v50, 0.0  ;;  %v333_v61 = vmax.f32 %v317_v51, 0.0  ;;  %v324_v62 = vmax.f32 %v308_v52, 0.0  ;;  %v316_v63 = vadd.f32 %v956_v27, %v288_v48 }
  0x1a   : > { %v339_v1 = vpack.c.bf16 %v325_v56, %v323_v55  ;;  %v330_v2 = vmax.f32 %v314_v58, 0.0  ;;  %v283_v3 = vmul.f32 %v954_v26, %v255_v40  ;;  %v285_v4 = vmul.f32 %v954_v26, %v257_v53 }
  0x1b   : > { %v343_v6 = vpack.c.bf16 %v333_v61, %v331_v60  ;;  %v338_v7 = vpack.c.bf16 %v324_v62, %v322_v57  ;;  %v332_v8 = vmax.f32 %v316_v63, 0.0  ;;  %v263_v9 = vunpack.c.h.bf16 %v248_v59 }
  0x1c   : > { %749 = vmatpush3.bf16.msra.mxu0 %v829_v30  ;;  %791 = vmatpush3.bf16.msra.mxu1 %v829_v30  ;;  %v311_v10 = vadd.f32 %v958_v28, %v283_v3  ;;  %v313_v11 = vadd.f32 %v958_v28, %v285_v4  ;;  %v265_v12 = vunpack.c.h.bf16 %v249_v0  ;;  %v254_v13 = vunpack.c.l.bf16 %v961_v29 }
  0x1d   : > { %750 = vmatprep.subr.bf16.mxu0 %v830_v35  ;;  %784 = vmatprep.subr.bf16.mxu1 %v830_v35  ;;  %v342_v14 = vpack.c.bf16 %v332_v8, %v330_v2  ;;  %v291_v15 = vmul.f32 %v954_v26, %v263_v9  ;;  %v256_v16 = vunpack.c.l.bf16 %v245_v39  ;;  %v262_v17 = vunpack.c.l.bf16 %v248_v59 }
  0x1e   : > { %506 = vmatprep.mubr.bf16.mxu0 %v339_v1  ;;  %522 = vmatprep.mubr.bf16.mxu1 %v343_v6  ;;  %v327_v18 = vmax.f32 %v311_v10, 0.0  ;;  %v329_v19 = vmax.f32 %v313_v11, 0.0  ;;  %v293_v20 = vmul.f32 %v954_v26, %v265_v12  ;;  %v282_v21 = vmul.f32 %v952_v25, %v254_v13 }
  0x1f   : > { %v319_v22 = vadd.f32 %v958_v28, %v291_v15  ;;  %v284_v23 = vmul.f32 %v952_v25, %v256_v16  ;;  %v264_v24 = vunpack.c.l.bf16 %v249_v0  ;;  %v290_v29 = vmul.f32 %v952_v25, %v262_v17 }
  0x20   : > { %751 = vmatpush3.bf16.msra.mxu0 %v831_v49  ;;  %792 = vmatpush3.bf16.msra.mxu1 %v831_v49  ;;  %v341_v30 = vpack.c.bf16 %v329_v19, %v327_v18  ;;  %v321_v31 = vadd.f32 %v958_v28, %v293_v20  ;;  %v310_v32 = vadd.f32 %v956_v27, %v282_v21 }
  0x21   : > { %752 = vmatprep.subr.bf16.mxu0 %v832_v54  ;;  %785 = vmatprep.subr.bf16.mxu1 %v832_v54  ;;  %v335_v33 = vmax.f32 %v319_v22, 0.0  ;;  %v312_v34 = vadd.f32 %v956_v27, %v284_v23  ;;  %v292_v26 = vmul.f32 %v952_v25, %v264_v24  ;;  %v318_v35 = vadd.f32 %v956_v27, %v290_v29 }
  0x22   : > { %v337_v36 = vmax.f32 %v321_v31, 0.0  ;;  %v326_v37 = vmax.f32 %v310_v32, 0.0 }
  0x23   : > { %v328_v38 = vmax.f32 %v312_v34, 0.0  ;;  %v320_v39 = vadd.f32 %v956_v27, %v292_v26  ;;  %v334_v40 = vmax.f32 %v318_v35, 0.0 }
  0x24   : > { %753 = vmatpush3.bf16.msra.mxu0 %v833_v5  ;;  %793 = vmatpush3.bf16.msra.mxu1 %v833_v5  ;;  %v345_v28 = vpack.c.bf16 %v337_v36, %v335_v33 }
  0x25   : > { %v336_v41 = vmax.f32 %v320_v39, 0.0  ;;  %v340_v42 = vpack.c.bf16 %v328_v38, %v326_v37 }
  0x27   : > { %507 = vmatmul.mubr.bf16.vlgmr.msra.gmra.mrb[0].mxu0 %v338_v7  ;;  %523 = vmatmul.mubr.bf16.vlgmr.msra.gmra.mrb[0].mxu1 %v342_v14  ;;  %v344_v43 = vpack.c.bf16 %v336_v41, %v334_v40 }
  0x28   : > { %514 = vmatprep.mubr.bf16.mxu0 %v341_v30  ;;  %530 = vmatprep.mubr.bf16.mxu1 %v345_v28 }
  0x2f   : > { %515 = vmatmul.mubr.bf16.gmra.mrb[4].mxu0 %v340_v42  ;;  %531 = vmatmul.mubr.bf16.gmra.mrb[4].mxu1 %v344_v43 }
  0xfa   : > { %v754_v25 = vpop.f32.mrb[0].mxu0  ;;  %v766_v44 = vpop.f32.mrb[0].mxu1 }
  0xfb   : > { %v755_v45 = vpop.f32.mrb[1].mxu0  ;;  %v767_v46 = vpop.f32.mrb[1].mxu1 }
  0xfc   : > { %v756_v47 = vadd.f32 %v755_v45, %v754_v25  ;;  %v768_v48 = vadd.f32 %v767_v46, %v766_v44  ;;  %v757_v49 = vpop.f32.mrb[2].mxu0  ;;  %v769_v50 = vpop.f32.mrb[2].mxu1 }
  0xfd   : > { %v758_v51 = vpop.f32.mrb[3].mxu0  ;;  %v770_v27 = vpop.f32.mrb[3].mxu1 }
  0xfe   : > { %v759_v52 = vadd.f32 %v758_v51, %v757_v49  ;;  %v771_v53 = vadd.f32 %v770_v27, %v769_v50 }
 0x100   : > { %v718_v54 = vpack.c.bf16 %v759_v52, %v756_v47  ;;  %v728_v55 = vpack.c.bf16 %v771_v53, %v768_v48 }
 0x102   : > { %719 = vst [vmem:[%s239_s15] sm:$0xff] %v718_v54   ;;  %736 = vst [vmem:[%s239_s15 + $0x10] sm:$0xff] %v728_v55   ;;  %v760_v56 = vpop.f32.mrb[4].mxu0  ;;  %v772_v57 = vpop.f32.mrb[4].mxu1 }
 0x103   : > { %v761_v58 = vpop.f32.mrb[5].mxu0  ;;  %v773_v59 = vpop.f32.mrb[5].mxu1 }
 0x104   : > { %v762_v60 = vadd.f32 %v761_v58, %v760_v56  ;;  %v774_v61 = vadd.f32 %v773_v59, %v772_v57  ;;  %v763_v62 = vpop.f32.mrb[6].mxu0  ;;  %v775_v63 = vpop.f32.mrb[6].mxu1 }
 0x105   : > { %v764_v0 = vpop.f32.mrb[7].mxu0  ;;  %v776_v1 = vpop.f32.mrb[7].mxu1 }
 0x106   : > { %v765_v2 = vadd.f32 %v764_v0, %v763_v62  ;;  %v777_v3 = vadd.f32 %v776_v1, %v775_v63 }
 0x108   : > { %v723_v4 = vpack.c.bf16 %v765_v2, %v762_v60  ;;  %v733_v5 = vpack.c.bf16 %v777_v3, %v774_v61 }
 0x10a   : > { %735 = vst [vmem:[%s239_s15 + $0x8] sm:$0xff] %v723_v4   ;;  %737 = vst [vmem:[%s239_s15 + $0x18] sm:$0xff] %v733_v5  }
 0x10b PF: > { %s14_s17 = sadd.s32 1, %s856_s17   ;;  %s1033_s15 = smov %s852_s16 }
 0x10c   : > { %p11_p5 = scmp.ge.s32.totalorder %s14_s17, 4   ;;  %s1034_s16 = smov %s1036_s18 }
 0x10e   :  { %13 = sbr.rel (!%p11_p5) target bundleno = 2 (0x2), region = 69 }

</bundles_post_ra>
